<compile_context>
chip_gen: v7x
topology: tpu7x:2x2x1
jax: 0.10.0
libtpu: 0.0.40
codegen_flags: <defaults>
</compile_context>

<pallas_src>
import functools

import jax
import jax.numpy as jnp
import numpy as np
from jax import lax
from jax.experimental import pallas as pl
from jax.experimental.pallas import tpu as pltpu


def _res_cbam_kernel(patch_ref, w1s_ref, w2_ref, wf1t_ref, wf2_ref, wsa_ref,
                     mask_ref, aff_ref, o_ref, col_ref, *,
                     W, HW, B_t, C_out, C_mid):
    f32 = jnp.float32
    bf16 = jnp.bfloat16
    L = B_t * HW

    aff = aff_ref[...]                       # (C_out, 6) folded BN scale/bias
    scale1, bias1 = aff[:, 0:1], aff[:, 1:2]
    scale2, bias2 = aff[:, 2:3], aff[:, 3:4]
    scale_s, bias_s = aff[:, 4:5], aff[:, 5:6]

    m_wm1 = mask_ref[0:1, :]                 # valid where w-1 >= 0
    m_wp1 = mask_ref[1:2, :]                 # valid where w+1 <  W
    m_hm1 = mask_ref[2:3, :]                 # valid where h-1 >= 0 (per image)
    m_hp1 = mask_ref[3:4, :]                 # valid where h+1 <  H (per image)

    def sigmoid(x):
        # exp + approximate reciprocal both ride the EUP slot (free-ish).
        return pl.reciprocal(1.0 + jnp.exp(-x), approx=True)

    def pad_flat(a):
        # zero-extend the flat (R, L) map by W+1 on both sides so every
        # shifted static slice below stays in range.
        z = jnp.zeros((a.shape[0], W + 1), f32)
        return jnp.concatenate([z, a, z], axis=1)

    def shifted(apad, kh, kw):
        # apad: (R, L + 2*(W+1)).  Returns the (h+kh-1, w+kw-1) neighbour map;
        # 3x3/padding=1 boundary behaviour (incl. image boundaries in the
        # lane-batched layout) is enforced by the four lane masks.
        off = (kh - 1) * W + (kw - 1)
        s = apad[:, W + 1 + off: W + 1 + off + L]
        if kh == 0:
            s = s * m_hm1
        elif kh == 2:
            s = s * m_hp1
        if kw == 0:
            s = s * m_wm1
        elif kw == 2:
            s = s * m_wp1
        return s

    # ---- conv1 (3x3) + 1x1 shortcut fused into one (2*C_out, 9*C_in) matmul
    t = jnp.dot(w1s_ref[...], patch_ref[...], preferred_element_type=f32)
    t1 = jnp.maximum(t[:C_out, :] * scale1 + bias1, 0.0)   # conv1+BN1+ReLU
    res = t[C_out:, :] * scale_s + bias_s                  # shortcut+BN_s

    # ---- conv2 (3x3): im2col into VMEM scratch via aligned static stores ----
    t1p = pad_flat(t1)
    for kh in range(3):
        for kw in range(3):
            tap = kh * 3 + kw
            col_ref[tap * C_out:(tap + 1) * C_out, :] = shifted(t1p, kh, kw)
    t2 = jnp.dot(w2_ref[...], col_ref[...].astype(bf16),
                 preferred_element_type=f32)
    t2 = t2 * scale2 + bias2                                # (C_out, L)

    # ---- channel attention (per image in the lane-batched tile) ----
    wf1t = wf1t_ref[...]                                    # (C_out, C_mid)
    wf2 = wf2_ref[...]                                      # (C_out, C_mid)
    t3_parts = []
    for b in range(B_t):
        seg = t2[:, b * HW:(b + 1) * HW]
        avg_c = jnp.sum(seg, axis=1, keepdims=True) * (1.0 / HW)
        max_c = jnp.max(seg, axis=1, keepdims=True)
        pooled = jnp.concatenate([avg_c, max_c], axis=1)    # (C_out, 2)
        if C_mid <= 4:   # tiny MLP on the VPU (avoids degenerate matmuls)
            logit = jnp.zeros((C_out, 2), f32)
            for m in range(C_mid):
                hm = jnp.sum(pooled * wf1t[:, m:m + 1], axis=0, keepdims=True)
                hm = jnp.maximum(hm, 0.0)                   # (1, 2)
                logit = logit + wf2[:, m:m + 1] * hm
        else:            # realistic C_out: two small contractions on the MXU
            hidden = jnp.maximum(
                lax.dot_general(wf1t, pooled, (((0,), (0,)), ((), ())),
                                preferred_element_type=f32), 0.0)  # (C_mid, 2)
            logit = jnp.dot(wf2, hidden, preferred_element_type=f32)
        ca = sigmoid(logit[:, 0:1] + logit[:, 1:2])         # (C_out, 1)
        t3_parts.append(seg * ca)
    t3 = t3_parts[0] if B_t == 1 else jnp.concatenate(t3_parts, axis=1)

    # ---- spatial attention: 3x3 conv over [mean_c, max_c] as 18 VPU FMAs ----
    wsa = wsa_ref[...]                                      # (2, 9)
    avg_p = pad_flat(jnp.mean(t3, axis=0, keepdims=True))
    max_p = pad_flat(jnp.max(t3, axis=0, keepdims=True))
    sa_logit = jnp.zeros((1, L), f32)
    for kh in range(3):
        for kw in range(3):
            tap = kh * 3 + kw
            sa_logit = (sa_logit
                        + wsa[0:1, tap:tap + 1] * shifted(avg_p, kh, kw)
                        + wsa[1:2, tap:tap + 1] * shifted(max_p, kh, kw))
    sa = sigmoid(sa_logit)

    # ---- residual add + final ReLU ----
    o_ref[...] = jnp.maximum(t3 * sa + res, 0.0)


def _grid_steps(N):
    """2 grid steps on 2-TensorCore chips (v7x/v4/v5p), else 1."""
    try:
        kind = jax.devices()[0].device_kind.lower()
    except Exception:
        kind = ""
    multi_tc = any(tag in kind for tag in ("v7", "7x", "v4", "v5p"))
    if multi_tc and N % 2 == 0 and N >= 2:
        return 2
    return 1


def res_cbam_block(x, p, eps=1e-5):
    """Fused Res_CBAM_block forward (stride=1, inference-mode BatchNorm)."""
    N, C_in, H, W = x.shape
    C_out = p["conv1_w"].shape[0]
    C_mid = p["fc1_w"].shape[0]
    HW = H * W
    f32 = jnp.float32
    bf16 = jnp.bfloat16

    steps = _grid_steps(N)
    B_t = N // steps
    L = B_t * HW

    # ---- glue (plain JAX / XLA): layout + parameter folding ----
    # im2col of the input, hoisted out of the kernel.  Columns are
    # image-major then (h, w) row-major; rows are tap-major, channel-inner.
    xf = x.astype(f32)
    xp = jnp.pad(xf, ((0, 0), (0, 0), (1, 1), (1, 1)))
    taps = [xp[:, :, kh:kh + H, kw:kw + W] for kh in range(3) for kw in range(3)]
    patch = jnp.stack(taps, axis=1).reshape(N, 9 * C_in, HW)
    patch = jnp.transpose(patch, (1, 0, 2)).reshape(9 * C_in, N * HW).astype(bf16)

    # conv1 weights -> (C_out, 9*C_in); 1x1 shortcut folded into the centre
    # tap (kh=kw=1) of an extra C_out rows -> stacked (2*C_out, 9*C_in) LHS.
    w1 = jnp.transpose(p["conv1_w"], (0, 2, 3, 1)).reshape(C_out, 9 * C_in).astype(f32)
    ws = p["ws_w"].reshape(C_out, C_in).astype(f32)
    ws_exp = jnp.zeros((C_out, 9 * C_in), f32).at[:, 4 * C_in:5 * C_in].set(ws)
    w1s = jnp.concatenate([w1, ws_exp], axis=0).astype(bf16)   # (2*C_out, 9*C_in)
    w2 = jnp.transpose(p["conv2_w"], (0, 2, 3, 1)).reshape(C_out, 9 * C_out).astype(bf16)
    wf1t = p["fc1_w"].reshape(C_mid, C_out).T.astype(f32)       # (C_out, C_mid)
    wf2 = p["fc2_w"].reshape(C_out, C_mid).astype(f32)          # (C_out, C_mid)
    wsa = p["sa_w"][0].reshape(2, 9).astype(f32)                # (2, 9)

    def fold(gamma, beta, mean, var, conv_b):
        s = gamma / jnp.sqrt(var + eps)
        return s, (conv_b - mean) * s + beta

    s1, b1 = fold(p["g1"], p["b1"], p["m1"], p["v1"], p["conv1_b"])
    s2, b2 = fold(p["g2"], p["b2"], p["m2"], p["v2"], p["conv2_b"])
    ss, bs = fold(p["gs"], p["bs"], p["ms"], p["vs"], p["ws_b"])
    affine = jnp.stack([s1, b1, s2, b2, ss, bs], axis=1).astype(f32)  # (C_out, 6)

    # boundary masks over the lane-batched axis (period = HW per image)
    pos = jnp.arange(L, dtype=jnp.int32) % HW
    hh, ww = pos // W, pos % W
    masks = jnp.stack([(ww >= 1), (ww <= W - 2), (hh >= 1), (hh <= H - 2)],
                      axis=0).astype(f32)                             # (4, L)

    kern = functools.partial(_res_cbam_kernel, W=W, HW=HW, B_t=B_t,
                             C_out=C_out, C_mid=C_mid)

    def full(shape):
        return pl.BlockSpec(shape, lambda n: (0,) * len(shape))

    out = pl.pallas_call(
        kern,
        out_shape=jax.ShapeDtypeStruct((C_out, N * HW), f32),
        grid_spec=pltpu.PrefetchScalarGridSpec(
            num_scalar_prefetch=0,
            grid=(steps,),
            in_specs=[
                pl.BlockSpec((9 * C_in, L), lambda n: (0, n)),   # im2col(x), bf16
                full((2 * C_out, 9 * C_in)),                     # w1 + shortcut
                full((C_out, 9 * C_out)),                        # w2
                full((C_out, C_mid)),                            # fc1^T
                full((C_out, C_mid)),                            # fc2
                full((2, 9)),                                    # spatial-attn w
                full((4, L)),                                    # boundary masks
                full((C_out, 6)),                                # folded BN
            ],
            out_specs=pl.BlockSpec((C_out, L), lambda n: (0, n)),
            scratch_shapes=[pltpu.VMEM((9 * C_out, L), jnp.float32)],  # conv2 im2col
        ),
        compiler_params=pltpu.CompilerParams(
            dimension_semantics=("parallel",)),
    )(patch, w1s, w2, wf1t, wf2, wsa, masks, affine)

    return out.reshape(C_out, N, H, W).transpose(1, 0, 2, 3)


def _reference(x, p, eps=1e-5):
    # Pure-JAX (XLA conv) reference matching the PyTorch forward pass
    # (BatchNorm in inference mode).
    dn = ("NCHW", "OIHW", "NCHW")

    def conv(v, w, pad):
        return lax.conv_general_dilated(v, w, (1, 1), ((pad, pad), (pad, pad)),
                                        dimension_numbers=dn)

    def bn(v, g, b, m, var):
        return ((v - m[None, :, None, None])
                / jnp.sqrt(var[None, :, None, None] + eps)
                * g[None, :, None, None] + b[None, :, None, None])

    out = conv(x, p["conv1_w"], 1) + p["conv1_b"][None, :, None, None]
    out = jnp.maximum(bn(out, p["g1"], p["b1"], p["m1"], p["v1"]), 0.0)
    out = conv(out, p["conv2_w"], 1) + p["conv2_b"][None, :, None, None]
    out = bn(out, p["g2"], p["b2"], p["m2"], p["v2"])

    avg = jnp.mean(out, axis=(2, 3), keepdims=True)
    mx = jnp.max(out, axis=(2, 3), keepdims=True)

    def mlp(v):
        return conv(jnp.maximum(conv(v, p["fc1_w"], 0), 0.0), p["fc2_w"], 0)

    ca = jax.nn.sigmoid(mlp(avg) + mlp(mx))
    out = out * ca

    avg_s = jnp.mean(out, axis=1, keepdims=True)
    max_s = jnp.max(out, axis=1, keepdims=True)
    sa = jax.nn.sigmoid(conv(jnp.concatenate([avg_s, max_s], axis=1),
                             p["sa_w"], 1))
    out = out * sa

    res = conv(x, p["ws_w"], 0) + p["ws_b"][None, :, None, None]
    res = bn(res, p["gs"], p["bs"], p["ms"], p["vs"])
    return jnp.maximum(out + res, 0.0)


if __name__ == "__main__":
    N, C_in, C_out, H, W = 2, 4, 8, 16, 16
    C_mid = max(C_out // 8, 1)
    f32 = jnp.float32

    key = jax.random.PRNGKey(0)
    ks = jax.random.split(key, 10)
    x = jax.random.normal(ks[0], (N, C_in, H, W), f32)

    ar = jnp.arange(C_out, dtype=f32)
    p = dict(
        conv1_w=jax.random.normal(ks[1], (C_out, C_in, 3, 3), f32) * 0.1,
        conv1_b=jax.random.normal(ks[2], (C_out,), f32) * 0.1,
        conv2_w=jax.random.normal(ks[3], (C_out, C_out, 3, 3), f32) * 0.1,
        conv2_b=jax.random.normal(ks[4], (C_out,), f32) * 0.1,
        ws_w=jax.random.normal(ks[5], (C_out, C_in, 1, 1), f32) * 0.1,
        ws_b=jax.random.normal(ks[6], (C_out,), f32) * 0.1,
        fc1_w=jax.random.normal(ks[7], (C_mid, C_out, 1, 1), f32) * 0.2,
        fc2_w=jax.random.normal(ks[8], (C_out, C_mid, 1, 1), f32) * 0.2,
        sa_w=jax.random.normal(ks[9], (1, 2, 3, 3), f32) * 0.2,
        # Deterministic BatchNorm running stats / affine (inference mode).
        g1=1.0 + 0.10 * ar, b1=0.05 * ar, m1=0.02 * ar, v1=1.0 + 0.10 * ar,
        g2=1.0 + 0.05 * ar, b2=0.03 * ar, m2=0.01 * ar, v2=1.0 + 0.05 * ar,
        gs=1.0 + 0.08 * ar, bs=0.02 * ar, ms=0.015 * ar, vs=1.0 + 0.07 * ar,
    )

    out = res_cbam_block(x, p)
    out = jax.block_until_ready(out)
    assert out.shape == (N, C_out, H, W)

    ref = _reference(x, p)
    # Tolerance reflects bf16 MXU operands (f32 accumulation) vs. the f32 ref.
    np.testing.assert_allclose(np.asarray(out), np.asarray(ref),
                               rtol=2e-2, atol=2e-2)
    print("KERNEL_OK")
</pallas_src>

<mosaic_0001>
module attributes {stable_mosaic.version = 11 : i64} {
  func.func @_res_cbam_kernel(%arg0: i32, %arg1: memref<36x512xbf16, #tpu.memory_space<vmem>>, %arg2: memref<16x36xbf16, #tpu.memory_space<vmem>>, %arg3: memref<8x72xbf16, #tpu.memory_space<vmem>>, %arg4: memref<8x1xf32, #tpu.memory_space<vmem>>, %arg5: memref<8x1xf32, #tpu.memory_space<vmem>>, %arg6: memref<2x9xf32, #tpu.memory_space<vmem>>, %arg7: memref<4x512xf32, #tpu.memory_space<vmem>>, %arg8: memref<8x6xf32, #tpu.memory_space<vmem>>, %arg9: memref<8x512xf32, #tpu.memory_space<vmem>>, %arg10: memref<72x512xf32, #tpu.memory_space<vmem>>) attributes {dimension_semantics = [#tpu.dimension_semantics<parallel>], iteration_bounds = array<i64: 1>, scalar_prefetch = 0 : i64, scratch_operands = 1 : i64, tpu.core_type = #tpu.core_type<tc>, window_params = [{transform_indices = @transform_0, window_bounds = array<i64: 36, 512>}, {pipeline_mode = #tpu.pipeline_mode<synchronous>, transform_indices = @transform_1, window_bounds = array<i64: 16, 36>}, {pipeline_mode = #tpu.pipeline_mode<synchronous>, transform_indices = @transform_2, window_bounds = array<i64: 8, 72>}, {pipeline_mode = #tpu.pipeline_mode<synchronous>, transform_indices = @transform_3, window_bounds = array<i64: 8, 1>}, {pipeline_mode = #tpu.pipeline_mode<synchronous>, transform_indices = @transform_4, window_bounds = array<i64: 8, 1>}, {pipeline_mode = #tpu.pipeline_mode<synchronous>, transform_indices = @transform_5, window_bounds = array<i64: 2, 9>}, {pipeline_mode = #tpu.pipeline_mode<synchronous>, transform_indices = @transform_6, window_bounds = array<i64: 4, 512>}, {pipeline_mode = #tpu.pipeline_mode<synchronous>, transform_indices = @transform_7, window_bounds = array<i64: 8, 6>}, {transform_indices = @transform_8, window_bounds = array<i64: 8, 512>}]} {
    %c0 = arith.constant 0 : index
    %c0_0 = arith.constant 0 : index
    %0 = vector.load %arg8[%c0, %c0_0] : memref<8x6xf32, #tpu.memory_space<vmem>>, vector<8x6xf32>
    %1 = vector.extract_strided_slice %0 {offsets = [0, 0], sizes = [8, 1], strides = [1, 1]} : vector<8x6xf32> to vector<8x1xf32>
    %2 = vector.extract_strided_slice %0 {offsets = [0, 1], sizes = [8, 1], strides = [1, 1]} : vector<8x6xf32> to vector<8x1xf32>
    %3 = vector.extract_strided_slice %0 {offsets = [0, 2], sizes = [8, 1], strides = [1, 1]} : vector<8x6xf32> to vector<8x1xf32>
    %4 = vector.extract_strided_slice %0 {offsets = [0, 3], sizes = [8, 1], strides = [1, 1]} : vector<8x6xf32> to vector<8x1xf32>
    %5 = vector.extract_strided_slice %0 {offsets = [0, 4], sizes = [8, 1], strides = [1, 1]} : vector<8x6xf32> to vector<8x1xf32>
    %6 = vector.extract_strided_slice %0 {offsets = [0, 5], sizes = [8, 1], strides = [1, 1]} : vector<8x6xf32> to vector<8x1xf32>
    %c0_1 = arith.constant 0 : index
    %c0_2 = arith.constant 0 : index
    %7 = vector.load %arg7[%c0_1, %c0_2] : memref<4x512xf32, #tpu.memory_space<vmem>>, vector<1x512xf32>
    %c1 = arith.constant 1 : index
    %c0_3 = arith.constant 0 : index
    %8 = vector.load %arg7[%c1, %c0_3] : memref<4x512xf32, #tpu.memory_space<vmem>>, vector<1x512xf32>
    %c2 = arith.constant 2 : index
    %c0_4 = arith.constant 0 : index
    %9 = vector.load %arg7[%c2, %c0_4] : memref<4x512xf32, #tpu.memory_space<vmem>>, vector<1x512xf32>
    %c3 = arith.constant 3 : index
    %c0_5 = arith.constant 0 : index
    %10 = vector.load %arg7[%c3, %c0_5] : memref<4x512xf32, #tpu.memory_space<vmem>>, vector<1x512xf32>
    %c0_6 = arith.constant 0 : index
    %c0_7 = arith.constant 0 : index
    %11 = vector.load %arg2[%c0_6, %c0_7] : memref<16x36xbf16, #tpu.memory_space<vmem>>, vector<16x36xbf16>
    %c0_8 = arith.constant 0 : index
    %c0_9 = arith.constant 0 : index
    %12 = vector.load %arg1[%c0_8, %c0_9] : memref<36x512xbf16, #tpu.memory_space<vmem>>, vector<36x512xbf16>
    %cst = arith.constant dense<0.000000e+00> : vector<16x512xf32>
    %13 = tpu.matmul %11, %12, %cst {dimension_numbers = #tpu.dot_dimension_numbers<[1], [0], [0], [1], [0, 0, 1, 1], [], []>} : vector<16x36xbf16>, vector<36x512xbf16>, vector<16x512xf32> -> vector<16x512xf32>
    %14 = vector.extract_strided_slice %13 {offsets = [0, 0], sizes = [8, 512], strides = [1, 1]} : vector<16x512xf32> to vector<8x512xf32>
    %15 = vector.broadcast %1 : vector<8x1xf32> to vector<8x512xf32>
    %16 = arith.mulf %14, %15 : vector<8x512xf32>
    %17 = vector.broadcast %2 : vector<8x1xf32> to vector<8x512xf32>
    %18 = arith.addf %16, %17 : vector<8x512xf32>
    %cst_10 = arith.constant 0.000000e+00 : f32
    %19 = vector.broadcast %cst_10 : f32 to vector<8x512xf32>
    %20 = arith.maximumf %18, %19 : vector<8x512xf32>
    %21 = vector.extract_strided_slice %13 {offsets = [8, 0], sizes = [8, 512], strides = [1, 1]} : vector<16x512xf32> to vector<8x512xf32>
    %22 = vector.broadcast %5 : vector<8x1xf32> to vector<8x512xf32>
    %23 = arith.mulf %21, %22 : vector<8x512xf32>
    %24 = vector.broadcast %6 : vector<8x1xf32> to vector<8x512xf32>
    %25 = arith.addf %23, %24 : vector<8x512xf32>
    %cst_11 = arith.constant 0.000000e+00 : f32
    %26 = vector.broadcast %cst_11 : f32 to vector<8x17xf32>
    %27 = tpu.concatenate %26, %20, %26 in 1 : vector<8x17xf32>, vector<8x512xf32>, vector<8x17xf32> -> vector<8x546xf32>
    %28 = vector.extract_strided_slice %27 {offsets = [0, 0], sizes = [8, 512], strides = [1, 1]} : vector<8x546xf32> to vector<8x512xf32>
    %29 = vector.broadcast %9 : vector<1x512xf32> to vector<8x512xf32>
    %30 = arith.mulf %28, %29 : vector<8x512xf32>
    %31 = vector.broadcast %7 : vector<1x512xf32> to vector<8x512xf32>
    %32 = arith.mulf %30, %31 : vector<8x512xf32>
    %c0_12 = arith.constant 0 : index
    %c0_13 = arith.constant 0 : index
    %33 = vector.load %arg10[%c0_12, %c0_13] : memref<72x512xf32, #tpu.memory_space<vmem>>, vector<8x512xf32>
    tpu.vector_store %arg10[%c0_12, %c0_13], %32 {strides = array<i32>} : memref<72x512xf32, #tpu.memory_space<vmem>>, vector<8x512xf32>,
    %34 = vector.extract_strided_slice %27 {offsets = [0, 1], sizes = [8, 512], strides = [1, 1]} : vector<8x546xf32> to vector<8x512xf32>
    %35 = vector.broadcast %9 : vector<1x512xf32> to vector<8x512xf32>
    %36 = arith.mulf %34, %35 : vector<8x512xf32>
    %c8 = arith.constant 8 : index
    %c0_14 = arith.constant 0 : index
    %37 = vector.load %arg10[%c8, %c0_14] : memref<72x512xf32, #tpu.memory_space<vmem>>, vector<8x512xf32>
    tpu.vector_store %arg10[%c8, %c0_14], %36 {strides = array<i32>} : memref<72x512xf32, #tpu.memory_space<vmem>>, vector<8x512xf32>,
    %38 = vector.extract_strided_slice %27 {offsets = [0, 2], sizes = [8, 512], strides = [1, 1]} : vector<8x546xf32> to vector<8x512xf32>
    %39 = vector.broadcast %9 : vector<1x512xf32> to vector<8x512xf32>
    %40 = arith.mulf %38, %39 : vector<8x512xf32>
    %41 = vector.broadcast %8 : vector<1x512xf32> to vector<8x512xf32>
    %42 = arith.mulf %40, %41 : vector<8x512xf32>
    %c16 = arith.constant 16 : index
    %c0_15 = arith.constant 0 : index
    %43 = vector.load %arg10[%c16, %c0_15] : memref<72x512xf32, #tpu.memory_space<vmem>>, vector<8x512xf32>
    tpu.vector_store %arg10[%c16, %c0_15], %42 {strides = array<i32>} : memref<72x512xf32, #tpu.memory_space<vmem>>, vector<8x512xf32>,
    %44 = vector.extract_strided_slice %27 {offsets = [0, 16], sizes = [8, 512], strides = [1, 1]} : vector<8x546xf32> to vector<8x512xf32>
    %45 = vector.broadcast %7 : vector<1x512xf32> to vector<8x512xf32>
    %46 = arith.mulf %44, %45 : vector<8x512xf32>
    %c24 = arith.constant 24 : index
    %c0_16 = arith.constant 0 : index
    %47 = vector.load %arg10[%c24, %c0_16] : memref<72x512xf32, #tpu.memory_space<vmem>>, vector<8x512xf32>
    tpu.vector_store %arg10[%c24, %c0_16], %46 {strides = array<i32>} : memref<72x512xf32, #tpu.memory_space<vmem>>, vector<8x512xf32>,
    %48 = vector.extract_strided_slice %27 {offsets = [0, 17], sizes = [8, 512], strides = [1, 1]} : vector<8x546xf32> to vector<8x512xf32>
    %c32 = arith.constant 32 : index
    %c0_17 = arith.constant 0 : index
    %49 = vector.load %arg10[%c32, %c0_17] : memref<72x512xf32, #tpu.memory_space<vmem>>, vector<8x512xf32>
    tpu.vector_store %arg10[%c32, %c0_17], %48 {strides = array<i32>} : memref<72x512xf32, #tpu.memory_space<vmem>>, vector<8x512xf32>,
    %50 = vector.extract_strided_slice %27 {offsets = [0, 18], sizes = [8, 512], strides = [1, 1]} : vector<8x546xf32> to vector<8x512xf32>
    %51 = vector.broadcast %8 : vector<1x512xf32> to vector<8x512xf32>
    %52 = arith.mulf %50, %51 : vector<8x512xf32>
    %c40 = arith.constant 40 : index
    %c0_18 = arith.constant 0 : index
    %53 = vector.load %arg10[%c40, %c0_18] : memref<72x512xf32, #tpu.memory_space<vmem>>, vector<8x512xf32>
    tpu.vector_store %arg10[%c40, %c0_18], %52 {strides = array<i32>} : memref<72x512xf32, #tpu.memory_space<vmem>>, vector<8x512xf32>,
    %54 = vector.extract_strided_slice %27 {offsets = [0, 32], sizes = [8, 512], strides = [1, 1]} : vector<8x546xf32> to vector<8x512xf32>
    %55 = vector.broadcast %10 : vector<1x512xf32> to vector<8x512xf32>
    %56 = arith.mulf %54, %55 : vector<8x512xf32>
    %57 = vector.broadcast %7 : vector<1x512xf32> to vector<8x512xf32>
    %58 = arith.mulf %56, %57 : vector<8x512xf32>
    %c48 = arith.constant 48 : index
    %c0_19 = arith.constant 0 : index
    %59 = vector.load %arg10[%c48, %c0_19] : memref<72x512xf32, #tpu.memory_space<vmem>>, vector<8x512xf32>
    tpu.vector_store %arg10[%c48, %c0_19], %58 {strides = array<i32>} : memref<72x512xf32, #tpu.memory_space<vmem>>, vector<8x512xf32>,
    %60 = vector.extract_strided_slice %27 {offsets = [0, 33], sizes = [8, 512], strides = [1, 1]} : vector<8x546xf32> to vector<8x512xf32>
    %61 = vector.broadcast %10 : vector<1x512xf32> to vector<8x512xf32>
    %62 = arith.mulf %60, %61 : vector<8x512xf32>
    %c56 = arith.constant 56 : index
    %c0_20 = arith.constant 0 : index
    %63 = vector.load %arg10[%c56, %c0_20] : memref<72x512xf32, #tpu.memory_space<vmem>>, vector<8x512xf32>
    tpu.vector_store %arg10[%c56, %c0_20], %62 {strides = array<i32>} : memref<72x512xf32, #tpu.memory_space<vmem>>, vector<8x512xf32>,
    %64 = vector.extract_strided_slice %27 {offsets = [0, 34], sizes = [8, 512], strides = [1, 1]} : vector<8x546xf32> to vector<8x512xf32>
    %65 = vector.broadcast %10 : vector<1x512xf32> to vector<8x512xf32>
    %66 = arith.mulf %64, %65 : vector<8x512xf32>
    %67 = vector.broadcast %8 : vector<1x512xf32> to vector<8x512xf32>
    %68 = arith.mulf %66, %67 : vector<8x512xf32>
    %c64 = arith.constant 64 : index
    %c0_21 = arith.constant 0 : index
    %69 = vector.load %arg10[%c64, %c0_21] : memref<72x512xf32, #tpu.memory_space<vmem>>, vector<8x512xf32>
    tpu.vector_store %arg10[%c64, %c0_21], %68 {strides = array<i32>} : memref<72x512xf32, #tpu.memory_space<vmem>>, vector<8x512xf32>,
    %c0_22 = arith.constant 0 : index
    %c0_23 = arith.constant 0 : index
    %70 = vector.load %arg3[%c0_22, %c0_23] : memref<8x72xbf16, #tpu.memory_space<vmem>>, vector<8x72xbf16>
    %c0_24 = arith.constant 0 : index
    %c0_25 = arith.constant 0 : index
    %71 = vector.load %arg10[%c0_24, %c0_25] : memref<72x512xf32, #tpu.memory_space<vmem>>, vector<72x512xf32>
    %72 = arith.truncf %71 : vector<72x512xf32> to vector<72x512xbf16>
    %cst_26 = arith.constant dense<0.000000e+00> : vector<8x512xf32>
    %73 = tpu.matmul %70, %72, %cst_26 {dimension_numbers = #tpu.dot_dimension_numbers<[1], [0], [0], [1], [0, 0, 1, 1], [], []>} : vector<8x72xbf16>, vector<72x512xbf16>, vector<8x512xf32> -> vector<8x512xf32>
    %74 = vector.broadcast %3 : vector<8x1xf32> to vector<8x512xf32>
    %75 = arith.mulf %73, %74 : vector<8x512xf32>
    %76 = vector.broadcast %4 : vector<8x1xf32> to vector<8x512xf32>
    %77 = arith.addf %75, %76 : vector<8x512xf32>
    %c0_27 = arith.constant 0 : index
    %c0_28 = arith.constant 0 : index
    %78 = vector.load %arg4[%c0_27, %c0_28] : memref<8x1xf32, #tpu.memory_space<vmem>>, vector<8x1xf32>
    %c0_29 = arith.constant 0 : index
    %c0_30 = arith.constant 0 : index
    %79 = vector.load %arg5[%c0_29, %c0_30] : memref<8x1xf32, #tpu.memory_space<vmem>>, vector<8x1xf32>
    %80 = vector.extract_strided_slice %77 {offsets = [0, 0], sizes = [8, 256], strides = [1, 1]} : vector<8x512xf32> to vector<8x256xf32>
    %cst_31 = arith.constant dense<0.000000e+00> : vector<8xf32>
    %81 = vector.multi_reduction <add>, %80, %cst_31 [1] : vector<8x256xf32> to vector<8xf32>
    %82 = vector.shape_cast %81 : vector<8xf32> to vector<8x1xf32>
    %cst_32 = arith.constant 3.906250e-03 : f32
    %83 = vector.broadcast %cst_32 : f32 to vector<8x1xf32>
    %84 = arith.mulf %82, %83 : vector<8x1xf32>
    %cst_33 = arith.constant dense<0xFF800000> : vector<8xf32>
    %85 = vector.multi_reduction <maximumf>, %80, %cst_33 [1] : vector<8x256xf32> to vector<8xf32>
    %86 = vector.shape_cast %85 : vector<8xf32> to vector<8x1xf32>
    %87 = tpu.concatenate %84, %86 in 1 : vector<8x1xf32>, vector<8x1xf32> -> vector<8x2xf32>
    %cst_34 = arith.constant 0.000000e+00 : f32
    %88 = vector.broadcast %cst_34 : f32 to vector<8x2xf32>
    %89 = vector.broadcast %78 : vector<8x1xf32> to vector<8x2xf32>
    %90 = arith.mulf %87, %89 : vector<8x2xf32>
    %cst_35 = arith.constant dense<0.000000e+00> : vector<2xf32>
    %91 = vector.multi_reduction <add>, %90, %cst_35 [0] : vector<8x2xf32> to vector<2xf32>
    %92 = vector.shape_cast %91 : vector<2xf32> to vector<1x2xf32>
    %cst_36 = arith.constant 0.000000e+00 : f32
    %93 = vector.broadcast %cst_36 : f32 to vector<1x2xf32>
    %94 = arith.maximumf %92, %93 : vector<1x2xf32>
    %95 = vector.broadcast %79 : vector<8x1xf32> to vector<8x2xf32>
    %96 = vector.broadcast %94 : vector<1x2xf32> to vector<8x2xf32>
    %97 = arith.mulf %95, %96 : vector<8x2xf32>
    %98 = arith.addf %88, %97 : vector<8x2xf32>
    %99 = vector.extract_strided_slice %98 {offsets = [0, 0], sizes = [8, 1], strides = [1, 1]} : vector<8x2xf32> to vector<8x1xf32>
    %100 = vector.extract_strided_slice %98 {offsets = [0, 1], sizes = [8, 1], strides = [1, 1]} : vector<8x2xf32> to vector<8x1xf32>
    %101 = arith.addf %99, %100 : vector<8x1xf32>
    %cst_37 = arith.constant 0.000000e+00 : f32
    %102 = vector.broadcast %cst_37 : f32 to vector<8x1xf32>
    %103 = arith.subf %102, %101 : vector<8x1xf32>
    %104 = math.exp %103 : vector<8x1xf32>
    %cst_38 = arith.constant 1.000000e+00 : f32
    %105 = vector.broadcast %cst_38 : f32 to vector<8x1xf32>
    %106 = arith.addf %105, %104 : vector<8x1xf32>
    %107 = tpu.reciprocal %106 {approx = true} : vector<8x1xf32> -> vector<8x1xf32>
    %108 = vector.broadcast %107 : vector<8x1xf32> to vector<8x256xf32>
    %109 = arith.mulf %80, %108 : vector<8x256xf32>
    %110 = vector.extract_strided_slice %77 {offsets = [0, 256], sizes = [8, 256], strides = [1, 1]} : vector<8x512xf32> to vector<8x256xf32>
    %cst_39 = arith.constant dense<0.000000e+00> : vector<8xf32>
    %111 = vector.multi_reduction <add>, %110, %cst_39 [1] : vector<8x256xf32> to vector<8xf32>
    %112 = vector.shape_cast %111 : vector<8xf32> to vector<8x1xf32>
    %cst_40 = arith.constant 3.906250e-03 : f32
    %113 = vector.broadcast %cst_40 : f32 to vector<8x1xf32>
    %114 = arith.mulf %112, %113 : vector<8x1xf32>
    %cst_41 = arith.constant dense<0xFF800000> : vector<8xf32>
    %115 = vector.multi_reduction <maximumf>, %110, %cst_41 [1] : vector<8x256xf32> to vector<8xf32>
    %116 = vector.shape_cast %115 : vector<8xf32> to vector<8x1xf32>
    %117 = tpu.concatenate %114, %116 in 1 : vector<8x1xf32>, vector<8x1xf32> -> vector<8x2xf32>
    %cst_42 = arith.constant 0.000000e+00 : f32
    %118 = vector.broadcast %cst_42 : f32 to vector<8x2xf32>
    %119 = vector.broadcast %78 : vector<8x1xf32> to vector<8x2xf32>
    %120 = arith.mulf %117, %119 : vector<8x2xf32>
    %cst_43 = arith.constant dense<0.000000e+00> : vector<2xf32>
    %121 = vector.multi_reduction <add>, %120, %cst_43 [0] : vector<8x2xf32> to vector<2xf32>
    %122 = vector.shape_cast %121 : vector<2xf32> to vector<1x2xf32>
    %cst_44 = arith.constant 0.000000e+00 : f32
    %123 = vector.broadcast %cst_44 : f32 to vector<1x2xf32>
    %124 = arith.maximumf %122, %123 : vector<1x2xf32>
    %125 = vector.broadcast %79 : vector<8x1xf32> to vector<8x2xf32>
    %126 = vector.broadcast %124 : vector<1x2xf32> to vector<8x2xf32>
    %127 = arith.mulf %125, %126 : vector<8x2xf32>
    %128 = arith.addf %118, %127 : vector<8x2xf32>
    %129 = vector.extract_strided_slice %128 {offsets = [0, 0], sizes = [8, 1], strides = [1, 1]} : vector<8x2xf32> to vector<8x1xf32>
    %130 = vector.extract_strided_slice %128 {offsets = [0, 1], sizes = [8, 1], strides = [1, 1]} : vector<8x2xf32> to vector<8x1xf32>
    %131 = arith.addf %129, %130 : vector<8x1xf32>
    %cst_45 = arith.constant 0.000000e+00 : f32
    %132 = vector.broadcast %cst_45 : f32 to vector<8x1xf32>
    %133 = arith.subf %132, %131 : vector<8x1xf32>
    %134 = math.exp %133 : vector<8x1xf32>
    %cst_46 = arith.constant 1.000000e+00 : f32
    %135 = vector.broadcast %cst_46 : f32 to vector<8x1xf32>
    %136 = arith.addf %135, %134 : vector<8x1xf32>
    %137 = tpu.reciprocal %136 {approx = true} : vector<8x1xf32> -> vector<8x1xf32>
    %138 = vector.broadcast %137 : vector<8x1xf32> to vector<8x256xf32>
    %139 = arith.mulf %110, %138 : vector<8x256xf32>
    %140 = tpu.concatenate %109, %139 in 1 : vector<8x256xf32>, vector<8x256xf32> -> vector<8x512xf32>
    %c0_47 = arith.constant 0 : index
    %c0_48 = arith.constant 0 : index
    %141 = vector.load %arg6[%c0_47, %c0_48] : memref<2x9xf32, #tpu.memory_space<vmem>>, vector<2x9xf32>
    %cst_49 = arith.constant dense<0.000000e+00> : vector<512xf32>
    %142 = vector.multi_reduction <add>, %140, %cst_49 [0] : vector<8x512xf32> to vector<512xf32>
    %143 = vector.shape_cast %142 : vector<512xf32> to vector<1x512xf32>
    %cst_50 = arith.constant 8.000000e+00 : f32
    %144 = vector.broadcast %cst_50 : f32 to vector<1x512xf32>
    %145 = arith.divf %143, %144 : vector<1x512xf32>
    %cst_51 = arith.constant 0.000000e+00 : f32
    %146 = vector.broadcast %cst_51 : f32 to vector<1x17xf32>
    %147 = tpu.concatenate %146, %145, %146 in 1 : vector<1x17xf32>, vector<1x512xf32>, vector<1x17xf32> -> vector<1x546xf32>
    %cst_52 = arith.constant dense<0xFF800000> : vector<512xf32>
    %148 = vector.multi_reduction <maximumf>, %140, %cst_52 [0] : vector<8x512xf32> to vector<512xf32>
    %149 = vector.shape_cast %148 : vector<512xf32> to vector<1x512xf32>
    %cst_53 = arith.constant 0.000000e+00 : f32
    %150 = vector.broadcast %cst_53 : f32 to vector<1x17xf32>
    %151 = tpu.concatenate %150, %149, %150 in 1 : vector<1x17xf32>, vector<1x512xf32>, vector<1x17xf32> -> vector<1x546xf32>
    %cst_54 = arith.constant 0.000000e+00 : f32
    %152 = vector.broadcast %cst_54 : f32 to vector<1x512xf32>
    %153 = vector.extract_strided_slice %141 {offsets = [0, 0], sizes = [1, 1], strides = [1, 1]} : vector<2x9xf32> to vector<1x1xf32>
    %154 = vector.extract_strided_slice %147 {offsets = [0, 0], sizes = [1, 512], strides = [1, 1]} : vector<1x546xf32> to vector<1x512xf32>
    %155 = arith.mulf %154, %9 : vector<1x512xf32>
    %156 = arith.mulf %155, %7 : vector<1x512xf32>
    %157 = vector.broadcast %153 : vector<1x1xf32> to vector<1x512xf32>
    %158 = arith.mulf %157, %156 : vector<1x512xf32>
    %159 = arith.addf %152, %158 : vector<1x512xf32>
    %160 = vector.extract_strided_slice %141 {offsets = [1, 0], sizes = [1, 1], strides = [1, 1]} : vector<2x9xf32> to vector<1x1xf32>
    %161 = vector.extract_strided_slice %151 {offsets = [0, 0], sizes = [1, 512], strides = [1, 1]} : vector<1x546xf32> to vector<1x512xf32>
    %162 = arith.mulf %161, %9 : vector<1x512xf32>
    %163 = arith.mulf %162, %7 : vector<1x512xf32>
    %164 = vector.broadcast %160 : vector<1x1xf32> to vector<1x512xf32>
    %165 = arith.mulf %164, %163 : vector<1x512xf32>
    %166 = arith.addf %159, %165 : vector<1x512xf32>
    %167 = vector.extract_strided_slice %141 {offsets = [0, 1], sizes = [1, 1], strides = [1, 1]} : vector<2x9xf32> to vector<1x1xf32>
    %168 = vector.extract_strided_slice %147 {offsets = [0, 1], sizes = [1, 512], strides = [1, 1]} : vector<1x546xf32> to vector<1x512xf32>
    %169 = arith.mulf %168, %9 : vector<1x512xf32>
    %170 = vector.broadcast %167 : vector<1x1xf32> to vector<1x512xf32>
    %171 = arith.mulf %170, %169 : vector<1x512xf32>
    %172 = arith.addf %166, %171 : vector<1x512xf32>
    %173 = vector.extract_strided_slice %141 {offsets = [1, 1], sizes = [1, 1], strides = [1, 1]} : vector<2x9xf32> to vector<1x1xf32>
    %174 = vector.extract_strided_slice %151 {offsets = [0, 1], sizes = [1, 512], strides = [1, 1]} : vector<1x546xf32> to vector<1x512xf32>
    %175 = arith.mulf %174, %9 : vector<1x512xf32>
    %176 = vector.broadcast %173 : vector<1x1xf32> to vector<1x512xf32>
    %177 = arith.mulf %176, %175 : vector<1x512xf32>
    %178 = arith.addf %172, %177 : vector<1x512xf32>
    %179 = vector.extract_strided_slice %141 {offsets = [0, 2], sizes = [1, 1], strides = [1, 1]} : vector<2x9xf32> to vector<1x1xf32>
    %180 = vector.extract_strided_slice %147 {offsets = [0, 2], sizes = [1, 512], strides = [1, 1]} : vector<1x546xf32> to vector<1x512xf32>
    %181 = arith.mulf %180, %9 : vector<1x512xf32>
    %182 = arith.mulf %181, %8 : vector<1x512xf32>
    %183 = vector.broadcast %179 : vector<1x1xf32> to vector<1x512xf32>
    %184 = arith.mulf %183, %182 : vector<1x512xf32>
    %185 = arith.addf %178, %184 : vector<1x512xf32>
    %186 = vector.extract_strided_slice %141 {offsets = [1, 2], sizes = [1, 1], strides = [1, 1]} : vector<2x9xf32> to vector<1x1xf32>
    %187 = vector.extract_strided_slice %151 {offsets = [0, 2], sizes = [1, 512], strides = [1, 1]} : vector<1x546xf32> to vector<1x512xf32>
    %188 = arith.mulf %187, %9 : vector<1x512xf32>
    %189 = arith.mulf %188, %8 : vector<1x512xf32>
    %190 = vector.broadcast %186 : vector<1x1xf32> to vector<1x512xf32>
    %191 = arith.mulf %190, %189 : vector<1x512xf32>
    %192 = arith.addf %185, %191 : vector<1x512xf32>
    %193 = vector.extract_strided_slice %141 {offsets = [0, 3], sizes = [1, 1], strides = [1, 1]} : vector<2x9xf32> to vector<1x1xf32>
    %194 = vector.extract_strided_slice %147 {offsets = [0, 16], sizes = [1, 512], strides = [1, 1]} : vector<1x546xf32> to vector<1x512xf32>
    %195 = arith.mulf %194, %7 : vector<1x512xf32>
    %196 = vector.broadcast %193 : vector<1x1xf32> to vector<1x512xf32>
    %197 = arith.mulf %196, %195 : vector<1x512xf32>
    %198 = arith.addf %192, %197 : vector<1x512xf32>
    %199 = vector.extract_strided_slice %141 {offsets = [1, 3], sizes = [1, 1], strides = [1, 1]} : vector<2x9xf32> to vector<1x1xf32>
    %200 = vector.extract_strided_slice %151 {offsets = [0, 16], sizes = [1, 512], strides = [1, 1]} : vector<1x546xf32> to vector<1x512xf32>
    %201 = arith.mulf %200, %7 : vector<1x512xf32>
    %202 = vector.broadcast %199 : vector<1x1xf32> to vector<1x512xf32>
    %203 = arith.mulf %202, %201 : vector<1x512xf32>
    %204 = arith.addf %198, %203 : vector<1x512xf32>
    %205 = vector.extract_strided_slice %141 {offsets = [0, 4], sizes = [1, 1], strides = [1, 1]} : vector<2x9xf32> to vector<1x1xf32>
    %206 = vector.extract_strided_slice %147 {offsets = [0, 17], sizes = [1, 512], strides = [1, 1]} : vector<1x546xf32> to vector<1x512xf32>
    %207 = vector.broadcast %205 : vector<1x1xf32> to vector<1x512xf32>
    %208 = arith.mulf %207, %206 : vector<1x512xf32>
    %209 = arith.addf %204, %208 : vector<1x512xf32>
    %210 = vector.extract_strided_slice %141 {offsets = [1, 4], sizes = [1, 1], strides = [1, 1]} : vector<2x9xf32> to vector<1x1xf32>
    %211 = vector.extract_strided_slice %151 {offsets = [0, 17], sizes = [1, 512], strides = [1, 1]} : vector<1x546xf32> to vector<1x512xf32>
    %212 = vector.broadcast %210 : vector<1x1xf32> to vector<1x512xf32>
    %213 = arith.mulf %212, %211 : vector<1x512xf32>
    %214 = arith.addf %209, %213 : vector<1x512xf32>
    %215 = vector.extract_strided_slice %141 {offsets = [0, 5], sizes = [1, 1], strides = [1, 1]} : vector<2x9xf32> to vector<1x1xf32>
    %216 = vector.extract_strided_slice %147 {offsets = [0, 18], sizes = [1, 512], strides = [1, 1]} : vector<1x546xf32> to vector<1x512xf32>
    %217 = arith.mulf %216, %8 : vector<1x512xf32>
    %218 = vector.broadcast %215 : vector<1x1xf32> to vector<1x512xf32>
    %219 = arith.mulf %218, %217 : vector<1x512xf32>
    %220 = arith.addf %214, %219 : vector<1x512xf32>
    %221 = vector.extract_strided_slice %141 {offsets = [1, 5], sizes = [1, 1], strides = [1, 1]} : vector<2x9xf32> to vector<1x1xf32>
    %222 = vector.extract_strided_slice %151 {offsets = [0, 18], sizes = [1, 512], strides = [1, 1]} : vector<1x546xf32> to vector<1x512xf32>
    %223 = arith.mulf %222, %8 : vector<1x512xf32>
    %224 = vector.broadcast %221 : vector<1x1xf32> to vector<1x512xf32>
    %225 = arith.mulf %224, %223 : vector<1x512xf32>
    %226 = arith.addf %220, %225 : vector<1x512xf32>
    %227 = vector.extract_strided_slice %141 {offsets = [0, 6], sizes = [1, 1], strides = [1, 1]} : vector<2x9xf32> to vector<1x1xf32>
    %228 = vector.extract_strided_slice %147 {offsets = [0, 32], sizes = [1, 512], strides = [1, 1]} : vector<1x546xf32> to vector<1x512xf32>
    %229 = arith.mulf %228, %10 : vector<1x512xf32>
    %230 = arith.mulf %229, %7 : vector<1x512xf32>
    %231 = vector.broadcast %227 : vector<1x1xf32> to vector<1x512xf32>
    %232 = arith.mulf %231, %230 : vector<1x512xf32>
    %233 = arith.addf %226, %232 : vector<1x512xf32>
    %234 = vector.extract_strided_slice %141 {offsets = [1, 6], sizes = [1, 1], strides = [1, 1]} : vector<2x9xf32> to vector<1x1xf32>
    %235 = vector.extract_strided_slice %151 {offsets = [0, 32], sizes = [1, 512], strides = [1, 1]} : vector<1x546xf32> to vector<1x512xf32>
    %236 = arith.mulf %235, %10 : vector<1x512xf32>
    %237 = arith.mulf %236, %7 : vector<1x512xf32>
    %238 = vector.broadcast %234 : vector<1x1xf32> to vector<1x512xf32>
    %239 = arith.mulf %238, %237 : vector<1x512xf32>
    %240 = arith.addf %233, %239 : vector<1x512xf32>
    %241 = vector.extract_strided_slice %141 {offsets = [0, 7], sizes = [1, 1], strides = [1, 1]} : vector<2x9xf32> to vector<1x1xf32>
    %242 = vector.extract_strided_slice %147 {offsets = [0, 33], sizes = [1, 512], strides = [1, 1]} : vector<1x546xf32> to vector<1x512xf32>
    %243 = arith.mulf %242, %10 : vector<1x512xf32>
    %244 = vector.broadcast %241 : vector<1x1xf32> to vector<1x512xf32>
    %245 = arith.mulf %244, %243 : vector<1x512xf32>
    %246 = arith.addf %240, %245 : vector<1x512xf32>
    %247 = vector.extract_strided_slice %141 {offsets = [1, 7], sizes = [1, 1], strides = [1, 1]} : vector<2x9xf32> to vector<1x1xf32>
    %248 = vector.extract_strided_slice %151 {offsets = [0, 33], sizes = [1, 512], strides = [1, 1]} : vector<1x546xf32> to vector<1x512xf32>
    %249 = arith.mulf %248, %10 : vector<1x512xf32>
    %250 = vector.broadcast %247 : vector<1x1xf32> to vector<1x512xf32>
    %251 = arith.mulf %250, %249 : vector<1x512xf32>
    %252 = arith.addf %246, %251 : vector<1x512xf32>
    %253 = vector.extract_strided_slice %141 {offsets = [0, 8], sizes = [1, 1], strides = [1, 1]} : vector<2x9xf32> to vector<1x1xf32>
    %254 = vector.extract_strided_slice %147 {offsets = [0, 34], sizes = [1, 512], strides = [1, 1]} : vector<1x546xf32> to vector<1x512xf32>
    %255 = arith.mulf %254, %10 : vector<1x512xf32>
    %256 = arith.mulf %255, %8 : vector<1x512xf32>
    %257 = vector.broadcast %253 : vector<1x1xf32> to vector<1x512xf32>
    %258 = arith.mulf %257, %256 : vector<1x512xf32>
    %259 = arith.addf %252, %258 : vector<1x512xf32>
    %260 = vector.extract_strided_slice %141 {offsets = [1, 8], sizes = [1, 1], strides = [1, 1]} : vector<2x9xf32> to vector<1x1xf32>
    %261 = vector.extract_strided_slice %151 {offsets = [0, 34], sizes = [1, 512], strides = [1, 1]} : vector<1x546xf32> to vector<1x512xf32>
    %262 = arith.mulf %261, %10 : vector<1x512xf32>
    %263 = arith.mulf %262, %8 : vector<1x512xf32>
    %264 = vector.broadcast %260 : vector<1x1xf32> to vector<1x512xf32>
    %265 = arith.mulf %264, %263 : vector<1x512xf32>
    %266 = arith.addf %259, %265 : vector<1x512xf32>
    %cst_55 = arith.constant 0.000000e+00 : f32
    %267 = vector.broadcast %cst_55 : f32 to vector<1x512xf32>
    %268 = arith.subf %267, %266 : vector<1x512xf32>
    %269 = math.exp %268 : vector<1x512xf32>
    %cst_56 = arith.constant 1.000000e+00 : f32
    %270 = vector.broadcast %cst_56 : f32 to vector<1x512xf32>
    %271 = arith.addf %270, %269 : vector<1x512xf32>
    %272 = tpu.reciprocal %271 {approx = true} : vector<1x512xf32> -> vector<1x512xf32>
    %273 = vector.broadcast %272 : vector<1x512xf32> to vector<8x512xf32>
    %274 = arith.mulf %140, %273 : vector<8x512xf32>
    %275 = arith.addf %274, %25 : vector<8x512xf32>
    %cst_57 = arith.constant 0.000000e+00 : f32
    %276 = vector.broadcast %cst_57 : f32 to vector<8x512xf32>
    %277 = arith.maximumf %275, %276 : vector<8x512xf32>
    %c0_58 = arith.constant 0 : index
    %c0_59 = arith.constant 0 : index
    %278 = vector.load %arg9[%c0_58, %c0_59] : memref<8x512xf32, #tpu.memory_space<vmem>>, vector<8x512xf32>
    tpu.vector_store %arg9[%c0_58, %c0_59], %277 {strides = array<i32>} : memref<8x512xf32, #tpu.memory_space<vmem>>, vector<8x512xf32>,
    return
  }
  func.func @transform_0(%arg0: i32) -> (i32, i32) {
    %c0_i32 = arith.constant 0 : i32
    %c0_i32_0 = arith.constant 0 : i32
    return %c0_i32, %arg0 : i32, i32
  }
  func.func @transform_1(%arg0: i32) -> (i32, i32) {
    %c0_i32 = arith.constant 0 : i32
    %c0_i32_0 = arith.constant 0 : i32
    %c0_i32_1 = arith.constant 0 : i32
    return %c0_i32, %c0_i32_0 : i32, i32
  }
  func.func @transform_2(%arg0: i32) -> (i32, i32) {
    %c0_i32 = arith.constant 0 : i32
    %c0_i32_0 = arith.constant 0 : i32
    %c0_i32_1 = arith.constant 0 : i32
    return %c0_i32, %c0_i32_0 : i32, i32
  }
  func.func @transform_3(%arg0: i32) -> (i32, i32) {
    %c0_i32 = arith.constant 0 : i32
    %c0_i32_0 = arith.constant 0 : i32
    %c0_i32_1 = arith.constant 0 : i32
    return %c0_i32, %c0_i32_0 : i32, i32
  }
  func.func @transform_4(%arg0: i32) -> (i32, i32) {
    %c0_i32 = arith.constant 0 : i32
    %c0_i32_0 = arith.constant 0 : i32
    %c0_i32_1 = arith.constant 0 : i32
    return %c0_i32, %c0_i32_0 : i32, i32
  }
  func.func @transform_5(%arg0: i32) -> (i32, i32) {
    %c0_i32 = arith.constant 0 : i32
    %c0_i32_0 = arith.constant 0 : i32
    %c0_i32_1 = arith.constant 0 : i32
    return %c0_i32, %c0_i32_0 : i32, i32
  }
  func.func @transform_6(%arg0: i32) -> (i32, i32) {
    %c0_i32 = arith.constant 0 : i32
    %c0_i32_0 = arith.constant 0 : i32
    %c0_i32_1 = arith.constant 0 : i32
    return %c0_i32, %c0_i32_0 : i32, i32
  }
  func.func @transform_7(%arg0: i32) -> (i32, i32) {
    %c0_i32 = arith.constant 0 : i32
    %c0_i32_0 = arith.constant 0 : i32
    %c0_i32_1 = arith.constant 0 : i32
    return %c0_i32, %c0_i32_0 : i32, i32
  }
  func.func @transform_8(%arg0: i32) -> (i32, i32) {
    %c0_i32 = arith.constant 0 : i32
    %c0_i32_0 = arith.constant 0 : i32
    return %c0_i32, %arg0 : i32, i32
  }
}

</mosaic_0001>

<bundles_post_ra>
// kernel: tpu_custom_call.1
= control target key start
LH: loop header
LB: loop body
LE: loop exit
PB: predicated region body
PF: predicated region fallthrough
CT: control target
= control target key end

     0   :  { %13 = vsyncpa [#allocation4], 0  ;;  %s3794_s0 = inlined_call_operand.hbm [shape: bf16[36,512], index: 0, kind: input, shape index: {}]   ;;  %s3795_s1 = inlined_call_operand.vmem [shape: bf16[16,36], index: 1, kind: input, shape index: {}]   ;;  %s3796_s2 = inlined_call_operand.hbm [shape: bf16[8,72], index: 2, kind: input, shape index: {}]   ;;  %s3797_s3 = inlined_call_operand.vmem [shape: f32[8,1], index: 3, kind: input, shape index: {}]   ;;  %s3798_s4 = inlined_call_operand.vmem [shape: f32[8,1], index: 4, kind: input, shape index: {}]   ;;  %s3799_s5 = inlined_call_operand.vmem [shape: f32[2,9], index: 5, kind: input, shape index: {}]   ;;  %s3800_s6 = inlined_call_operand.vmem [shape: f32[4,512], index: 6, kind: input, shape index: {}]   ;;  %s3801_s7 = inlined_call_operand.vmem [shape: f32[8,6], index: 7, kind: input, shape index: {}]   ;;  %s3802_s8 = inlined_call_operand.hbm [shape: f32[8,512], index: 8, kind: output, shape index: {}]  }
   0x1   :  { %14 = vsyncpa [#allocation7], 0 }
   0x2   :  { %15 = vsyncpa [#allocation5], 0  ;;  %s2337_s27 = smov [#allocation3]   ;;  %s2265_s9 = scalar_lea.hbm %s3794_s0, 1280 }
   0x3   :  { %s21_s28 = sshll.u32 %s2337_s27, 4  ;;  %p2266_p0 = scmp.ne.s32.totalorder %s3794_s0, %s2265_s9  ;;  %s22_s28 = int_to_ptr.vmem [resolvable:$true] %s21_s28 }
   0x4   :  { %p2269_p1 = scmp.lt.u32.totalorder %s2265_s9, %s3794_s0 }
   0x6   :  { %p2271_p2 = pnand %p2269_p1, %p2266_p0 }
   0x8   :  { %2274 = shalt.err (!%p2271_p2)
}
   0x9   :  { %s2275_s14 = scalar_lea.vmem %s22_s28, 1280  ;;  %p2280_p4 = scmp.lt.s32.totalorder %s22_s28, %s22_s28 }
   0xa   :  { %p2276_p3 = scmp.ne.s32.totalorder %s22_s28, %s2275_s14  ;;  %p2281_p5 = scmp.lt.s32.totalorder %s2275_s14, %s2275_s14 }
   0xc   :  { %p2282_p6 = por %p2281_p5, %p2280_p4 }
   0xe   :  { %p2283_p7 = pnand %p2282_p6, %p2276_p3 }
  0x10   :  { %2286 = shalt.err (!%p2283_p7)
}
  0x11   :  { %s2338_s15 = smov 256   ;;  %s2339_s16 = smov 16  }
  0x12   :  { %27 = dma.hbm_to_vmem [thread:$0]  %s3794_s0, 1280, %s22_s28, [#allocation4], %s2338_s15, %s2338_s15, %s2339_s16  }
  0x13   :  { %s2340_s19 = smov [#allocation6]   ;;  %s2287_s23 = scalar_lea.hbm %s3796_s2, 64 }
  0x14   :  { %s36_s20 = sshll.u32 %s2340_s19, 4  ;;  %p2288_p8 = scmp.ne.s32.totalorder %s3796_s2, %s2287_s23  ;;  %s37_s20 = int_to_ptr.vmem [resolvable:$true] %s36_s20 }
  0x15   :  { %p2291_p9 = scmp.lt.u32.totalorder %s2287_s23, %s3796_s2 }
  0x17   :  { %p2293_p10 = pnand %p2291_p9, %p2288_p8 }
  0x19   :  { %2296 = shalt.err (!%p2293_p10)
}
  0x1a   :  { %s2297_s29 = scalar_lea.vmem %s37_s20, 64  ;;  %p2302_p12 = scmp.lt.s32.totalorder %s37_s20, %s37_s20 }
  0x1b   :  { %p2298_p11 = scmp.ne.s32.totalorder %s37_s20, %s2297_s29  ;;  %p2303_p13 = scmp.lt.s32.totalorder %s2297_s29, %s2297_s29 }
  0x1d   :  { %p2304_p0 = por %p2303_p13, %p2302_p12 }
  0x1f   :  { %p2305_p1 = pnand %p2304_p0, %p2298_p11 }
  0x21   :  { %2308 = shalt.err (!%p2305_p1)
}
  0x22   :  { %39 = dma.hbm_to_vmem [thread:$0]  %s3796_s2, 64, %s37_s20, [#allocation7]  }
  0x23   :  { %2331 = dma.done.wait [#allocation4], 1280  }
  0x24   :  { %2332 = vsyncadd [#allocation4], 4294966016 }
  0x25   :  { %2333 = dma.done.wait [#allocation7], 64  }
  0x26   :  { %2334 = vsyncadd [#allocation7], 4294967232  ;;  %v3804_v0 = vmov 0   ;;  %v296_v1 = vlaneseq  ;;  %v2223_v3 = vld [vmem:[#allocation3 + $0x4] ss:$16 sps:$4 sm:$0xff]   ;;  %vm136_vm0 = vcmask 1041408  }
  0x27   :  { %181 = vmatprep.mubr.bf16.mxu0 %v3804_v0  ;;  %224 = vmatprep.mubr.bf16.mxu1 %v3804_v0  ;;  %v2225_v4 = vld [vmem:[#allocation3 + $0xc] ss:$16 sps:$4 sm:$0xff]   ;;  %v2227_v5 = vld [vmem:[#allocation3] ss:$16 sps:$4 sm:$0xff]   ;;  %v2228_v6 = vld [vmem:[#allocation3 + $0x8] ss:$16 sps:$4 sm:$0xff]  }
  0x28   :  { %2126 = vset.pattern.permute.xlu0 %v3804_v0  ;;  %v297_v2 = vshrl.u32 %v296_v1, 7  ;;  %149 = vmatprep.subr.bf16.mxu0 %v2223_v3  ;;  %v2229_v7 = vld [vmem:[#allocation3 + $0x24] ss:$16 sps:$4 sm:$0xff]   ;;  %v2231_v9 = vld [vmem:[#allocation3 + $0x2c] ss:$16 sps:$4 sm:$0xff]   ;;  %s2342_s11 = smov 1  }
  0x29   :  { %192 = vmatprep.subr.bf16.mxu1 %v2225_v4  ;;  %150 = vmatpush1.bf16.msra.mxu0 %v2227_v5  ;;  %v2233_v10 = vld [vmem:[#allocation3 + $0x20] ss:$16 sps:$4 sm:$0xff]   ;;  %v2234_v12 = vld [vmem:[#allocation3 + $0x28] ss:$16 sps:$4 sm:$0xff]   ;;  %vm132_vm1 = vcmask 293888   ;;  %v3803_v27 = vmov 1  }
  0x2a   :  { %v2439_v8 = vsub.s32 0, %v297_v2  ;;  %193 = vmatpush1.bf16.msra.mxu1 %v2228_v6  ;;  %v2441_v11 = vsub.s32 2, %v297_v2  ;;  %151 = vmatprep.subr.bf16.mxu0 %v2229_v7  ;;  %v75_v13 = vld [vmem:[#allocation3 + $0x40] sm:$0x33]  ;;  %v76_v14 = vld [vmem:[#allocation3 + $0x48] sm:$0x33] }
  0x2b   :  { %194 = vmatprep.subr.bf16.mxu1 %v2231_v9  ;;  %v2086_v15 = vcombine.high %v75_v13, %v75_v13  ;;  %v2088_v16 = vcombine.high %v76_v14, %v76_v14  ;;  %v2085_v17 = vcombine.low %v75_v13, %v75_v13  ;;  %v2087_v18 = vcombine.low %v76_v14, %v76_v14  ;;  %v2446_v19 = vld [vmem:[%s3801_s7] sm:$0xff]  ;;  %s2345_s19 = smov 18   ;;  %s2346_s22 = smov 32  }
  0x2c   :  { %3891 = vst [vmem:[#allocation12_spill] sm:$0xff] %v2439_v8  ;;  %v2074_v20 = vld [vmem:[%s3800_s6 + $0x2] ss:$4 sm:$0xf]  ;;  %237 = vperm.xlu0 %2126, %v2446_v19   ;;  %v302_v26 = vsub.s32 1, %v297_v2  ;;  %v310_v29 = vsub.s32 3, %v297_v2 }
  0x2d   :  { %152 = vmatpush1.bf16.msra.mxu0 %v2233_v10  ;;  %v2452_v21 = vrot.slane %v2074_v20, %v2439_v8  ;;  %v138_v22 = vsel %vm136_vm0, %v2085_v17, 0  ;;  %v144_v23 = vsel %vm136_vm0, %v2087_v18, 0  ;;  %v2461_v24 = vrot.slane %v2074_v20, %v2441_v11  ;;  %v2239_v25 = vld [vmem:[%s3795_s1] sm:$0xff]   ;;  %s2344_s1 = smov 2   ;;  %s2349_s23 = smov 34  }
  0x2e   :  { %195 = vmatpush1.bf16.msra.mxu1 %v2234_v12  ;;  %2089 = vmatprep.subr.msk.bf16.mxu0 %vm136_vm0, %v2086_v15  ;;  %v2469_v28 = vrot.slane %v2074_v20, %v302_v26  ;;  %v2073_v30 = vld [vmem:[%s3800_s6 + $0x1] ss:$4 sm:$0xf]  ;;  %v2478_v31 = vrot.slane %v2074_v20, %v310_v29  ;;  %v58_v34 = vld [vmem:[%s3800_s6] ss:$4 sm:$0xf] }
  0x2f   :  { %2091 = vmatprep.subr.msk.bf16.mxu1 %vm136_vm0, %v2088_v16  ;;  %349 = vrot.lane.b32.xlu1 %v2452_v21, %s2342_s11  ;;  %v2482_v32 = vrot.slane %v2073_v30, %v2439_v8  ;;  %v2487_v33 = vrot.slane %v2073_v30, %v2441_v11  ;;  %v2495_v35 = vrot.slane %v58_v34, %v2439_v8  ;;  %v2075_v40 = vld [vmem:[%s3800_s6 + $0x3] ss:$4 sm:$0xf]  ;;  %s2347_s6 = smov 33   ;;  %vm284_vm2 = vcmask 138240   ;;  %s2350_s24 = smov 111  }
  0x30   :  { %2127 = vset.pattern.permute.xlu0 %v3803_v27  ;;  %3892 = vst [vmem:[#allocation13_spill] sm:$0xff] %v2478_v31  ;;  %v2498_v36 = vrot.slane %v2073_v30, %v302_v26  ;;  %v2503_v37 = vrot.slane %v58_v34, %v2441_v11  ;;  %v2506_v38 = vrot.slane %v2073_v30, %v310_v29  ;;  %vm357_vm3 = vcmask 7168   ;;  %s2351_s25 = smov 127   ;;  %s2352_s26 = smov 112  }
  0x31   :  { %154 = vmatpush1.bf16.msra.mxu0 %v138_v22  ;;  %245 = vperm.xlu0 %2127, %v2446_v19   ;;  %v2511_v39 = vrot.slane %v58_v34, %v302_v26  ;;  %v2519_v41 = vrot.slane %v58_v34, %v310_v29  ;;  %v616_v42 = vrot.slane %v2075_v40, %v2439_v8  ;;  %vm495_vm4 = vcmask 130048   ;;  %s2353_s27 = smov 110   ;;  %s2354_s29 = smov 95  }
  0x32   :  { %197 = vmatpush1.bf16.msra.mxu1 %v144_v23  ;;  %3893 = vst [vmem:[#allocation14_spill] sm:$0xff] %v2503_v37  ;;  %v624_v43 = vrot.slane %v2075_v40, %v2441_v11  ;;  %v620_v44 = vrot.slane %v2075_v40, %v302_v26  ;;  %v628_v45 = vrot.slane %v2075_v40, %v310_v29  ;;  %vm570_vm5 = vcmask 146432   ;;  %s2355_s0 = smov 126   ;;  %s2356_s28 = smov 96  }
  0x33   :  { %353 = vrot.lane.b32.xlu1 %v2461_v24, %s2342_s11  ;;  %3894 = vst [vmem:[#allocation15_spill] sm:$0xff] %v2519_v41  ;;  %vm708_vm6 = vcmask 269312   ;;  %vm407_vm7 = vcmask 15360   ;;  %vm637_vm8 = vcmask 261120   ;;  %vm758_vm9 = vcmask 277504   ;;  %s2357_s2 = smov 94  }
  0x34   :  { %2090 = vmatmul.mubr.msk.bf16.vlgmr.msra.gmra.mrb[0].mxu0 %vm132_vm1, %v2239_v25  ;;  %vm386_vm10 = vcmask 1039360   ;;  %vm549_vm11 = vcmask 908288   ;;  %vm524_vm12 = vcmask 916480   ;;  %vm599_vm13 = vcmask 900096  }
  0x35   :  { %2092 = vmatmul.mubr.msk.bf16.vlgmr.msra.gmra.mrb[0].mxu1 %vm132_vm1, %v2239_v25  ;;  %927 = vmatprep.mubr.bf16.mxu0 %v3804_v0  ;;  %vm737_vm14 = vcmask 777216   ;;  %vm474_vm15 = vcmask 1031168   ;;  %vm687_vm0 = vcmask 785408   ;;  %vm808_vm1 = vcmask 769024  }
  0x36   :  { %968 = vmatprep.mubr.bf16.mxu1 %v3804_v0  ;;  %351 = vrot.lane.b32.xlu0 %v2469_v28, %s2342_s11 }
  0x37   :  { %399 = vrot.lane.b32.xlu1 %v2452_v21, %s2344_s1 }
  0x3a   :  { %355 = vrot.lane.b32.xlu0 %v2478_v31, %s2342_s11 }
  0x3b   :  { %403 = vrot.lane.b32.xlu1 %v2461_v24, %s2344_s1 }
  0x3e   :  { %401 = vrot.lane.b32.xlu0 %v2469_v28, %s2344_s1 }
  0x3f   :  { %438 = vrot.lane.b32.xlu1 %v2482_v32, %s2344_s1 }
  0x42   :  { %405 = vrot.lane.b32.xlu0 %v2478_v31, %s2344_s1 }
  0x43   :  { %442 = vrot.lane.b32.xlu1 %v2487_v33, %s2344_s1 }
  0x46   :  { %440 = vrot.lane.b32.xlu0 %v2498_v36, %s2344_s1 }
  0x47   :  { %487 = vrot.lane.b32.xlu1 %v2495_v35, %s2339_s16 }
  0x4a   :  { %444 = vrot.lane.b32.xlu0 %v2506_v38, %s2344_s1 }
  0x4b   :  { %491 = vrot.lane.b32.xlu1 %v2503_v37, %s2339_s16 }
  0x4e   :  { %489 = vrot.lane.b32.xlu0 %v2511_v39, %s2339_s16 }
  0x4f   :  { %562 = vrot.lane.b32.xlu1 %v2482_v32, %s2345_s19 }
  0x52   :  { %493 = vrot.lane.b32.xlu0 %v2519_v41, %s2339_s16  ;;  %s2348_s16 = smov 17  }
  0x53   :  { %566 = vrot.lane.b32.xlu1 %v2487_v33, %s2345_s19 }
  0x56   :  { %564 = vrot.lane.b32.xlu0 %v2498_v36, %s2345_s19 }
  0x57   :  { %629 = vrot.lane.b32.xlu1 %v616_v42, %s2346_s22 }
  0x5a   :  { %568 = vrot.lane.b32.xlu0 %v2506_v38, %s2345_s19 }
  0x5b   :  { %633 = vrot.lane.b32.xlu1 %v624_v43, %s2346_s22 }
  0x5e   :  { %631 = vrot.lane.b32.xlu0 %v620_v44, %s2346_s22 }
  0x5f   :  { %651 = vrot.lane.b32.xlu1 %v2495_v35, %s2346_s22 }
  0x62   :  { %635 = vrot.lane.b32.xlu0 %v628_v45, %s2346_s22 }
  0x63   :  { %655 = vrot.lane.b32.xlu1 %v2503_v37, %s2346_s22 }
  0x66   :  { %653 = vrot.lane.b32.xlu0 %v2511_v39, %s2346_s22 }
  0x67   :  { %700 = vrot.lane.b32.xlu1 %v616_v42, %s2347_s6 }
  0x6a   :  { %657 = vrot.lane.b32.xlu0 %v2519_v41, %s2346_s22 }
  0x6b   :  { %704 = vrot.lane.b32.xlu1 %v624_v43, %s2347_s6 }
  0x6e   :  { %702 = vrot.lane.b32.xlu0 %v620_v44, %s2347_s6 }
  0x72   :  { %706 = vrot.lane.b32.xlu0 %v628_v45, %s2347_s6 }
  0xa1   :  { %v2546_v5 = vpop.permute.xlu1 %349 }
  0xa5   :  { %v2552_v7 = vpop.permute.xlu1 %353 }
  0xa9   :  { %v2556_v10 = vpop.permute.xlu1 %399 }
  0xaa   :  { %3899 = vst [vmem:[#allocation20_spill] sm:$0xff] %v2556_v10 }
  0xab   :  { %v238_v46 = vpop.permute.xlu0 %237 }
  0xad   :  { %v2560_v12 = vpop.permute.xlu1 %403 }
  0xb0   :  { %v246_v47 = vpop.permute.xlu0 %245 }
  0xb1   :  { %v2564_v14 = vpop.permute.xlu1 %438 }
  0xb2   :  { %3901 = vst [vmem:[#allocation22_spill] sm:$0xff] %v2564_v14 }
  0xb4   :  { %v2549_v6 = vpop.permute.xlu0 %351 }
  0xb5   :  { %v2568_v16 = vpop.permute.xlu1 %442 }
  0xb8   :  { %v2554_v9 = vpop.permute.xlu0 %355 }
  0xb9   :  { %v2572_v18 = vpop.permute.xlu1 %487 }
  0xbc   :  { %v2558_v11 = vpop.permute.xlu0 %401 }
  0xbd   :  { %v2574_v22 = vpop.permute.xlu1 %491 }
  0xc0   :  { %v2562_v13 = vpop.permute.xlu0 %405 }
  0xc1   :  { %3900 = vst [vmem:[#allocation21_spill] sm:$0xff] %v2562_v13  ;;  %v2578_v25 = vpop.permute.xlu1 %562 }
  0xc4   :  { %v2566_v15 = vpop.permute.xlu0 %440 }
  0xc5   :  { %v2580_v29 = vpop.permute.xlu1 %566 }
  0xc8   :  { %v2570_v17 = vpop.permute.xlu0 %444 }
  0xc9   :  { %3902 = vst [vmem:[#allocation23_spill] sm:$0xff] %v2570_v17 }
  0xcc   :  { %v490_v20 = vpop.permute.xlu0 %489 }
  0xd0   :  { %v2576_v23 = vpop.permute.xlu0 %493 }
  0xd4   :  { %v565_v26 = vpop.permute.xlu0 %564 }
  0xd8   :  { %v2582_v30 = vpop.permute.xlu0 %568 }
 0x107   :  { %v183_v48 = vpop.f32.mrb[0].mxu0 }
 0x108   :  { %v226_v49 = vpop.f32.mrb[0].mxu1  ;;  %v240_v50 = vmul.f32 %v238_v46, %v183_v48  ;;  %v185_v52 = vpop.f32.mrb[1].mxu0 }
 0x109   :  { %v242_v51 = vmul.f32 %v238_v46, %v226_v49  ;;  %v228_v53 = vpop.f32.mrb[1].mxu1  ;;  %v2532_v55 = vpop.f32.mrb[2].mxu0  ;;  %v241_v61 = vmul.f32 %v238_v46, %v185_v52 }
 0x10a   :  { %v243_v54 = vmul.f32 %v238_v46, %v228_v53  ;;  %3895 = vst [vmem:[#allocation16_spill] sm:$0xff] %v2532_v55  ;;  %v2534_v56 = vpop.f32.mrb[2].mxu1  ;;  %v2536_v57 = vpop.f32.mrb[3].mxu0  ;;  %v248_v59 = vadd.f32 %v246_v47, %v240_v50 }
 0x10b   :  { %3896 = vst [vmem:[#allocation17_spill] sm:$0xff] %v2534_v56  ;;  %3897 = vst [vmem:[#allocation18_spill] sm:$0xff] %v2536_v57  ;;  %v2538_v58 = vpop.f32.mrb[3].mxu1  ;;  %v250_v63 = vadd.f32 %v246_v47, %v242_v51  ;;  %v249_v3 = vadd.f32 %v246_v47, %v241_v61 }
 0x10c   :  { %3898 = vst [vmem:[#allocation19_spill] sm:$0xff] %v2538_v58  ;;  %v251_v60 = vadd.f32 %v246_v47, %v243_v54  ;;  %v252_v62 = vmax.f32 %v248_v59, 0.0 }
 0x10d   :  { %v254_v2 = vmax.f32 %v250_v63, 0.0  ;;  %v253_v4 = vmax.f32 %v249_v3, 0.0 }
 0x10e   :  { %v255_v1 = vmax.f32 %v251_v60, 0.0  ;;  %276 = vrot.lane.b32.xlu1 %v252_v62, %s2348_s16  ;;  %v2629_v62 = vsel %vm357_vm3, %v2552_v7, %v2554_v9 }
 0x110   :  { %282 = vrot.lane.b32.xlu0 %v255_v1, %s2348_s16 }
 0x112   :  { %280 = vrot.lane.b32.xlu1 %v254_v2, %s2348_s16 }
 0x114   :  { %752 = vrot.lane.b32.xlu0 %v620_v44, %s2349_s23 }
 0x116   :  { %278 = vrot.lane.b32.xlu1 %v253_v4, %s2348_s16  ;;  %v2643_v4 = vsel %vm495_vm4, %v2572_v18, %v490_v20 }
 0x118   :  { %756 = vrot.lane.b32.xlu0 %v628_v45, %s2349_s23 }
 0x11a   :  { %750 = vrot.lane.b32.xlu1 %v616_v42, %s2349_s23 }
 0x11c   :  { %774 = vrot.lane.b32.xlu0 %v2498_v36, %s2349_s23 }
 0x11e   :  { %754 = vrot.lane.b32.xlu1 %v624_v43, %s2349_s23 }
 0x120   :  { %778 = vrot.lane.b32.xlu0 %v2506_v38, %s2349_s23 }
 0x122   :  { %772 = vrot.lane.b32.xlu1 %v2482_v32, %s2349_s23  ;;  %v2584_v32 = vpop.permute.xlu1 %629 }
 0x123   :  { %3903 = vst [vmem:[#allocation24_spill] sm:$0xff] %v2584_v32 }
 0x126   :  { %776 = vrot.lane.b32.xlu1 %v2487_v33, %s2349_s23  ;;  %v2586_v33 = vpop.permute.xlu0 %631  ;;  %v2588_v34 = vpop.permute.xlu1 %633 }
 0x12a   :  { %v2590_v36 = vpop.permute.xlu0 %635  ;;  %v2592_v38 = vpop.permute.xlu1 %651 }
 0x12b   :  { %3904 = vst [vmem:[#allocation25_spill] sm:$0xff] %v2590_v36  ;;  %3905 = vst [vmem:[#allocation26_spill] sm:$0xff] %v2592_v38 }
 0x12e   :  { %v2594_v40 = vpop.permute.xlu0 %653  ;;  %v2596_v42 = vpop.permute.xlu1 %655 }
 0x132   :  { %v2598_v43 = vpop.permute.xlu0 %657  ;;  %v2600_v44 = vpop.permute.xlu1 %700 }
 0x133   :  { %3906 = vst [vmem:[#allocation27_spill] sm:$0xff] %v2598_v43 }
 0x136   :  { %v703_v45 = vpop.permute.xlu0 %702  ;;  %v2602_v46 = vpop.permute.xlu1 %704 }
 0x13a   :  { %v2604_v47 = vpop.permute.xlu0 %706 }
 0x13b   :  { %3907 = vst [vmem:[#allocation28_spill] sm:$0xff] %v2604_v47 }
 0x180   :  { %v277_v48 = vpop.permute.xlu1 %276 }
 0x181   :  { %v2607_v49 = vsel %vm284_vm2, 0.0, %v277_v48 }
 0x182   :  { %v283_v50 = vpop.permute.xlu0 %282  ;;  %539 = vrot.lane.b32.xlu0 %v2607_v49, %s2350_s24  ;;  %v366_v1 = vmul.f32 %v2546_v5, %v2607_v49  ;;  %v416_v8 = vmul.f32 %v2556_v10, %v2607_v49 }
 0x183   :  { %v2612_v52 = vsel %vm284_vm2, %v283_v50, 0.0 }
 0x184   :  { %v281_v51 = vpop.permute.xlu1 %280  ;;  %v370_v3 = vmul.f32 %v2554_v9, %v2612_v52 }
 0x185   :  { %v2615_v53 = vsel %vm284_vm2, %v281_v51, %v283_v50  ;;  %v504_v50 = vmul.f32 %v2572_v18, %v2607_v49 }
 0x186   :  { %v2133_v54 = vpack.i.bf16 %v2612_v52, %v2615_v53  ;;  %v369_v2 = vmul.f32 %v2629_v62, %v2615_v53  ;;  %v2708_v57 = vpop.permute.xlu0 %752 }
 0x188   :  { %v279_v59 = vpop.permute.xlu1 %278  ;;  %2134 = vrot.lane.b32.xlu1 %v2133_v54, %s2350_s24 }
 0x189   :  { %v2621_v60 = vsel %vm284_vm2, %v277_v48, %v279_v59  ;;  %v2624_v61 = vsel %vm284_vm2, %v279_v59, %v281_v51  ;;  %v2647_v48 = vsel %vm495_vm4, %v490_v20, %v2574_v22  ;;  %v2143_v51 = vpack.i.bf16 %v370_v3, %v369_v2 }
 0x18a   :  { %v2128_v63 = vpack.i.bf16 %v2624_v61, %v2621_v60  ;;  %v505_v54 = vmul.f32 %v2643_v4, %v2621_v60  ;;  %v506_v59 = vmul.f32 %v2647_v48, %v2624_v61  ;;  %v2663_v20 = vsel %vm357_vm3, %v2549_v6, %v2552_v7  ;;  %v2753_v55 = vpop.permute.xlu0 %756 }
 0x18b   :  { %v2673_v2 = vsel %vm570_vm5, %v565_v26, %v2580_v29  ;;  %v579_v3 = vmul.f32 %v2578_v25, %v2607_v49  ;;  %3913 = vst [vmem:[#allocation34_spill] sm:$0xff] %v2753_v55 }
 0x18c   :  { %2129 = vrot.lane.b32.xlu0 %v2128_v63, %s2350_s24  ;;  %376 = vrot.lane.b32.xlu1 %v366_v1, %s2351_s25  ;;  %v2658_v63 = vsel %vm357_vm3, %v2546_v5, %v2549_v6  ;;  %v2669_v1 = vsel %vm570_vm5, %v2578_v25, %v565_v26  ;;  %v2148_v7 = vpack.i.bf16 %v506_v59, %v505_v54  ;;  %v2702_v58 = vpop.permute.xlu1 %750 }
 0x18d   :  { %v367_v6 = vmul.f32 %v2658_v63, %v2621_v60  ;;  %v581_v27 = vmul.f32 %v2673_v2, %v2624_v61  ;;  %v2690_v26 = vsel %vm495_vm4, %v2574_v22, %v2576_v23  ;;  %v2694_v54 = vsel %vm708_vm6, %v2600_v44, %v703_v45  ;;  %3909 = vst [vmem:[#allocation30_spill] sm:$0xff] %v2702_v58 }
 0x18e   :  { %v2698_v59 = vsel %vm708_vm6, %v703_v45, %v2602_v46  ;;  %v507_v0 = vmul.f32 %v2690_v26, %v2615_v53  ;;  %v718_v56 = vmul.f32 %v2694_v54, %v2621_v60  ;;  %v508_v45 = vmul.f32 %v2576_v23, %v2612_v52 }
 0x18f   :  { %3908 = vst [vmem:[#allocation29_spill] sm:$0xff] %v2698_v59  ;;  %v719_v22 = vmul.f32 %v2698_v59, %v2624_v61  ;;  %vm882_vm4 = vcmask 1043456  }
 0x190   :  { %514 = vrot.lane.b32.xlu1 %v504_v50, %s2352_s26  ;;  %2144 = vrot.lane.b32.xlu0 %v2143_v51, %s2351_s25  ;;  %v368_v50 = vmul.f32 %v2663_v20, %v2624_v61  ;;  %v580_v51 = vmul.f32 %v2669_v1, %v2621_v60 }
 0x194   :  { %589 = vrot.lane.b32.xlu1 %v579_v3, %s2353_s27  ;;  %2149 = vrot.lane.b32.xlu0 %v2148_v7, %s2352_s26  ;;  %v2138_v3 = vpack.i.bf16 %v368_v50, %v367_v6  ;;  %v2158_v7 = vpack.i.bf16 %v581_v27, %v580_v51  ;;  %v2717_v27 = vsel %vm570_vm5, %v2580_v29, %v2582_v30  ;;  %v755_v29 = vpop.permute.xlu1 %754  ;;  %vm878_vm5 = vcmask 588800  }
 0x195   :  { %v2153_v6 = vpack.i.bf16 %v508_v45, %v507_v0  ;;  %v2168_v50 = vpack.i.bf16 %v719_v22, %v718_v56  ;;  %v582_v51 = vmul.f32 %v2717_v27, %v2615_v53  ;;  %v583_v0 = vmul.f32 %v2582_v30, %v2612_v52 }
 0x196   :  { %v2740_v56 = vsel %vm708_vm6, %v2602_v46, %v2604_v47  ;;  %v2745_v22 = vsel %vm407_vm7, %v2558_v11, %v2560_v12  ;;  %v454_v46 = vmul.f32 %v2564_v14, %v416_v8  ;;  %v2775_v8 = vsel %vm407_vm7, %v2568_v16, %v2570_v17 }
 0x197   :  { %3912 = vst [vmem:[#allocation33_spill] sm:$0xff] %v2745_v22  ;;  %v720_v45 = vmul.f32 %v2740_v56, %v2615_v53  ;;  %3916 = vst [vmem:[#allocation37_spill] sm:$0xff] %v2775_v8 }
 0x198   :  { %2139 = vrot.lane.b32.xlu1 %v2138_v3, %s2351_s25  ;;  %2159 = vrot.lane.b32.xlu0 %v2158_v7, %s2353_s27  ;;  %v2726_v3 = vsel %vm407_vm7, %v2556_v10, %v2558_v11  ;;  %v2731_v7 = vsel %vm407_vm7, %v2560_v12, %v2562_v13  ;;  %v2163_v10 = vpack.i.bf16 %v583_v0, %v582_v51 }
 0x199   :  { %3910 = vst [vmem:[#allocation31_spill] sm:$0xff] %v2726_v3  ;;  %3911 = vst [vmem:[#allocation32_spill] sm:$0xff] %v2731_v7  ;;  %v417_v59 = vmul.f32 %v2726_v3, %v2621_v60  ;;  %v418_v11 = vmul.f32 %v2745_v22, %v2624_v61  ;;  %v2763_v12 = vsel %vm407_vm7, %v2564_v14, %v2566_v15  ;;  %v2793_v3 = vpop.permute.xlu1 %772 }
 0x19a   :  { %3914 = vst [vmem:[#allocation35_spill] sm:$0xff] %v2763_v12  ;;  %v721_v51 = vmul.f32 %v2604_v47, %v2612_v52  ;;  %v2780_v0 = vsel %vm637_vm8, %v2584_v32, %v2586_v33  ;;  %v2785_v14 = vsel %vm637_vm8, %v2586_v33, %v2588_v34  ;;  %3919 = vst [vmem:[#allocation40_spill] sm:$0xff] %v2793_v3 }
 0x19b   :  { %3917 = vst [vmem:[#allocation38_spill] sm:$0xff] %v2780_v0  ;;  %3918 = vst [vmem:[#allocation39_spill] sm:$0xff] %v2785_v14  ;;  %v455_v47 = vmul.f32 %v2763_v12, %v417_v59 }
 0x19c   :  { %2154 = vrot.lane.b32.xlu1 %v2153_v6, %s2352_s26  ;;  %2169 = vrot.lane.b32.xlu0 %v2168_v50, %s2354_s29  ;;  %v646_v6 = vmul.f32 %v2584_v32, %v2607_v49  ;;  %v419_v50 = vmul.f32 %v2731_v7, %v2615_v53  ;;  %v2768_v7 = vsel %vm407_vm7, %v2566_v15, %v2568_v16 }
 0x19d   :  { %3915 = vst [vmem:[#allocation36_spill] sm:$0xff] %v2768_v7  ;;  %v420_v15 = vmul.f32 %v2562_v13, %v2612_v52  ;;  %v2173_v16 = vpack.i.bf16 %v721_v51, %v720_v45  ;;  %v456_v33 = vmul.f32 %v2768_v7, %v418_v11  ;;  %v2804_v45 = vsel %vm637_vm8, %v2588_v34, %v2590_v36 }
 0x19e   :  { %v667_v22 = vmul.f32 %v2592_v38, %v646_v6  ;;  %v457_v32 = vmul.f32 %v2775_v8, %v419_v50  ;;  %3920 = vst [vmem:[#allocation41_spill] sm:$0xff] %v2804_v45  ;;  %v775_v6 = vpop.permute.xlu0 %774  ;;  %v2812_v50 = vsel %vm637_vm8, %v2592_v38, %v2594_v40  ;;  %v2817_v11 = vsel %vm637_vm8, %v2594_v40, %v2596_v42  ;;  %v777_v40 = vpop.permute.xlu1 %776 }
 0x19f   :  { %v458_v59 = vmul.f32 %v2570_v17, %v420_v15  ;;  %3921 = vst [vmem:[#allocation42_spill] sm:$0xff] %v2812_v50  ;;  %3922 = vst [vmem:[#allocation43_spill] sm:$0xff] %v2817_v11  ;;  %v2822_v34 = vsel %vm758_vm9, %v2702_v58, %v2708_v57  ;;  %v2178_v15 = vpack.i.bf16 %v456_v33, %v455_v47 }
 0x1a0   :  { %2164 = vrot.lane.b32.xlu1 %v2163_v10, %s2353_s27  ;;  %464 = vrot.lane.b32.xlu0 %v454_v46, %s2355_s0  ;;  %v647_v10 = vmul.f32 %v2780_v0, %v2621_v60  ;;  %v648_v46 = vmul.f32 %v2785_v14, %v2624_v61  ;;  %3923 = vst [vmem:[#allocation44_spill] sm:$0xff] %v2822_v34 }
 0x1a1   :  { %v2183_v51 = vpack.i.bf16 %v458_v59, %v457_v32  ;;  %v2830_v14 = vsel %vm758_vm9, %v2793_v3, %v775_v6  ;;  %v650_v0 = vmul.f32 %v2590_v36, %v2612_v52  ;;  %v767_v32 = vmul.f32 %v2702_v58, %v2607_v49 }
 0x1a2   :  { %v669_v38 = vmul.f32 %v2817_v11, %v648_v46  ;;  %3924 = vst [vmem:[#allocation45_spill] sm:$0xff] %v2830_v14  ;;  %v768_v47 = vmul.f32 %v2822_v34, %v2621_v60  ;;  %v2842_v33 = vsel %vm758_vm9, %v2708_v57, %v755_v29  ;;  %v717_v46 = vmul.f32 %v2600_v44, %v2607_v49 }
 0x1a3   :  { %3925 = vst [vmem:[#allocation46_spill] sm:$0xff] %v2842_v33  ;;  %v2853_v59 = vsel %vm637_vm8, %v2596_v42, %v2598_v43  ;;  %v788_v57 = vmul.f32 %v2793_v3, %v767_v32  ;;  %v769_v42 = vmul.f32 %v2842_v33, %v2624_v61 }
 0x1a4   :  { %2174 = vrot.lane.b32.xlu1 %v2173_v16, %s2354_s29  ;;  %677 = vrot.lane.b32.xlu0 %v667_v22, %s2356_s28  ;;  %v649_v22 = vmul.f32 %v2804_v45, %v2615_v53  ;;  %v668_v16 = vmul.f32 %v2812_v50, %v647_v10  ;;  %v2846_v10 = vsel %vm758_vm9, %v755_v29, %v2753_v55 }
 0x1a5   :  { %3926 = vst [vmem:[#allocation47_spill] sm:$0xff] %v2846_v10  ;;  %3927 = vst [vmem:[#allocation48_spill] sm:$0xff] %v2853_v59  ;;  %v789_v58 = vmul.f32 %v2830_v14, %v768_v47  ;;  %v2861_v29 = vsel %vm758_vm9, %v775_v6, %v777_v40  ;;  %v770_v11 = vmul.f32 %v2846_v10, %v2615_v53  ;;  %v3839_v47 = vmov 2  }
 0x1a6   :  { %v670_v34 = vmul.f32 %v2853_v59, %v649_v22  ;;  %3929 = vst [vmem:[#allocation50_spill] sm:$0xff] %v2861_v29  ;;  %v790_v22 = vmul.f32 %v2861_v29, %v769_v42  ;;  %2208 = vset.pattern.permute.xlu1 %v3839_v47  ;;  %v319_v42 = vmul.f32 %v2478_v31, %v2615_v53 }
 0x1a7   :  { %v2198_v32 = vpack.i.bf16 %v789_v58, %v788_v57  ;;  %v3931_v58 = vmov 0   ;;  %v318_v53 = vmul.f32 %v2461_v24, %v2624_v61  ;;  %v316_v47 = vmul.f32 %v2452_v21, %v2607_v49 }
 0x1a8   :  { %2184 = vrot.lane.b32.xlu1 %v2183_v51, %s2355_s0  ;;  %2179 = vrot.lane.b32.xlu0 %v2178_v15, %s2355_s0  ;;  %v2855_v51 = vpop.permute.xlu0 %778  ;;  %v2188_v15 = vpack.i.bf16 %v669_v38, %v668_v16  ;;  %v671_v38 = vmul.f32 %v2598_v43, %v650_v0 }
 0x1a9   :  { %3928 = vst [vmem:[#allocation49_spill] sm:$0xff] %v2855_v51  ;;  %v2865_v36 = vsel %vm758_vm9, %v777_v40, %v2855_v51  ;;  %v771_v40 = vmul.f32 %v2753_v55, %v2612_v52  ;;  %v343_v10 = vmul.f32 %v2503_v37, %v318_v53 }
 0x1aa   :  { %3930 = vst [vmem:[#allocation51_spill] sm:$0xff] %v2865_v36  ;;  %v791_v6 = vmul.f32 %v2865_v36, %v770_v11  ;;  %v2193_v16 = vpack.i.bf16 %v671_v38, %v670_v34 }
 0x1ab   :  { %v792_v0 = vmul.f32 %v2855_v51, %v771_v40 }
 0x1ac   :  { %727 = vrot.lane.b32.xlu1 %v717_v46, %s2354_s29  ;;  %2189 = vrot.lane.b32.xlu0 %v2188_v15, %s2356_s28  ;;  %v3838_v46 = vmov 3   ;;  %v2203_v15 = vpack.i.bf16 %v791_v6, %v790_v22 }
 0x1ad   :  { %2209 = vset.pattern.permute.xlu0 %v3838_v46  ;;  %v317_v46 = vmul.f32 %v2469_v28, %v2621_v60 }
 0x1b0   :  { %2194 = vrot.lane.b32.xlu1 %v2193_v16, %s2356_s28  ;;  %2199 = vrot.lane.b32.xlu0 %v2198_v32, %s2357_s2 }
 0x1b4   :  { %806 = vrot.lane.b32.xlu0 %v792_v0, %s2357_s2  ;;  %2204 = vrot.lane.b32.xlu1 %v2203_v15, %s2357_s2 }
 0x1b8   :  { %978 = vperm.xlu1 %2208, %v2446_v19   ;;  %986 = vperm.xlu0 %2209, %v2446_v19   ;;  %v344_v19 = vmul.f32 %v2519_v41, %v319_v42 }
 0x1bc   :  { %2210 = vset.pattern.permute.xlu1 %v3931_v58  ;;  %2211 = vset.pattern.permute.xlu0 %v3931_v58 }
 0x1f4   :  { %v2889_v52 = vpop.permute.xlu0 %539 }
 0x1fa   :  { %v2891_v11 = vpop.permute.xlu1 %2134 }
 0x1fe   :  { %v377_v34 = vpop.permute.xlu1 %376  ;;  %v2893_v57 = vpop.permute.xlu0 %2129 }
 0x202   :  { %v515_v38 = vpop.permute.xlu1 %514  ;;  %v2145_v22 = vpop.permute.xlu0 %2144 }
 0x203   :  { %v2147_v6 = vunpack.i.h.bf16 %v2145_v22  ;;  %v2146_v16 = vunpack.i.l.bf16 %v2145_v22 }
 0x205   :  { %v390_v32 = vsel %vm386_vm10, %v2146_v16, %v2147_v6  ;;  %v342_v6 = vmul.f32 %v2511_v39, %v317_v46 }
 0x206   :  { %v2899_v40 = vpop.permute.xlu1 %589  ;;  %v2150_v0 = vpop.permute.xlu0 %2149  ;;  %v861_v15 = vpack.c.bf16 %v390_v32, %v344_v19  ;;  %v341_v19 = vmul.f32 %v2495_v35, %v316_v47  ;;  %v2137_v47 = vunpack.i.h.bf16 %v2891_v11 }
 0x207   :  { %v2152_v53 = vunpack.i.h.bf16 %v2150_v0 }
 0x208   :  { %936 = vmatprep.subr.bf16.mxu1 %v861_v15 }
 0x20a   :  { %v2140_v36 = vpop.permute.xlu1 %2139  ;;  %v2907_v22 = vpop.permute.xlu0 %2159 }
 0x20b   :  { %v2142_v42 = vunpack.i.h.bf16 %v2140_v36  ;;  %v2141_v51 = vunpack.i.l.bf16 %v2140_v36 }
 0x20d   :  { %v387_v32 = vsel %vm386_vm10, %v377_v34, %v2141_v51  ;;  %v389_v60 = vsel %vm386_vm10, %v2142_v42, %v2146_v16  ;;  %v388_v61 = vsel %vm386_vm10, %v2141_v51, %v2142_v42  ;;  %v2136_v34 = vunpack.i.l.bf16 %v2891_v11 }
 0x20e   :  { %v2155_v15 = vpop.permute.xlu1 %2154  ;;  %v2915_v55 = vpop.permute.xlu0 %2169  ;;  %v859_v49 = vpack.c.bf16 %v388_v61, %v342_v6  ;;  %v860_v29 = vpack.c.bf16 %v389_v60, %v343_v10  ;;  %v858_v33 = vpack.c.bf16 %v387_v32, %v341_v19  ;;  %v2132_v16 = vunpack.i.h.bf16 %v2893_v57 }
 0x20f   :  { %v2131_v51 = vunpack.i.l.bf16 %v2893_v57  ;;  %v2151_v42 = vunpack.i.l.bf16 %v2150_v0  ;;  %v2162_v6 = vunpack.i.h.bf16 %v2907_v22  ;;  %v2161_v10 = vunpack.i.l.bf16 %v2907_v22 }
 0x210   :  { %895 = vmatprep.subr.bf16.mxu0 %v859_v49  ;;  %937 = vmatpush1.bf16.msra.mxu1 %v860_v29  ;;  %v2157_v29 = vunpack.i.h.bf16 %v2155_v15  ;;  %v2156_v32 = vunpack.i.l.bf16 %v2155_v15  ;;  %v553_v0 = vsel %vm549_vm11, %v2136_v34, %v2137_v47  ;;  %v2172_v22 = vunpack.i.h.bf16 %v2915_v55 }
 0x211   :  { %896 = vmatpush1.bf16.msra.mxu0 %v858_v33  ;;  %v551_v57 = vsel %vm549_vm11, %v2131_v51, %v2132_v16  ;;  %v525_v61 = vsel %vm524_vm12, %v515_v38, %v2151_v42  ;;  %v526_v3 = vsel %vm524_vm12, %v2151_v42, %v2152_v53  ;;  %v601_v43 = vsel %vm599_vm13, %v2161_v10, %v2162_v6 }
 0x212   :  { %v2165_v36 = vpop.permute.xlu1 %2164  ;;  %v465_v46 = vpop.permute.xlu0 %464  ;;  %v527_v50 = vsel %vm524_vm12, %v2152_v53, %v2156_v32  ;;  %v2171_v17 = vunpack.i.l.bf16 %v2915_v55  ;;  %v528_v47 = vsel %vm524_vm12, %v2156_v32, %v2157_v29  ;;  %v600_v55 = vsel %vm599_vm13, %v2899_v40, %v2161_v10 }
 0x213   :  { %v2167_v11 = vunpack.i.h.bf16 %v2165_v36  ;;  %v2166_v60 = vunpack.i.l.bf16 %v2165_v36 }
 0x215   :  { %v603_v38 = vsel %vm599_vm13, %v2166_v60, %v2167_v11  ;;  %v602_v29 = vsel %vm599_vm13, %v2162_v6, %v2166_v60 }
 0x216   :  { %v2923_v19 = vpop.permute.xlu1 %2174  ;;  %v2925_v33 = vpop.permute.xlu0 %677 }
 0x217   :  { %v2177_v31 = vunpack.i.h.bf16 %v2923_v19 }
 0x21a   :  { %v2185_v49 = vpop.permute.xlu1 %2184  ;;  %v2180_v14 = vpop.permute.xlu0 %2179 }
 0x21b   :  { %v2187_v59 = vunpack.i.h.bf16 %v2185_v49  ;;  %v2186_v15 = vunpack.i.l.bf16 %v2185_v49  ;;  %v2182_v45 = vunpack.i.h.bf16 %v2180_v14  ;;  %v2181_v36 = vunpack.i.l.bf16 %v2180_v14 }
 0x21d   :  { %v477_v8 = vsel %vm474_vm15, %v2182_v45, %v2186_v15  ;;  %v475_v13 = vsel %vm474_vm15, %v465_v46, %v2181_v36  ;;  %v476_v42 = vsel %vm474_vm15, %v2181_v36, %v2182_v45  ;;  %v478_v7 = vsel %vm474_vm15, %v2186_v15, %v2187_v59 }
 0x21e   :  { %v728_v12 = vpop.permute.xlu1 %727  ;;  %v2190_v49 = vpop.permute.xlu0 %2189  ;;  %v863_v41 = vpack.c.bf16 %v526_v3, %v476_v42  ;;  %v865_v14 = vpack.c.bf16 %v528_v47, %v478_v7  ;;  %v862_v37 = vpack.c.bf16 %v525_v61, %v475_v13  ;;  %v864_v53 = vpack.c.bf16 %v527_v50, %v477_v8 }
 0x21f   :  { %v2192_v32 = vunpack.i.h.bf16 %v2190_v49  ;;  %v2191_v11 = vunpack.i.l.bf16 %v2190_v49  ;;  %v2176_v46 = vunpack.i.l.bf16 %v2923_v19  ;;  %v867_v45 = vpack.c.bf16 %v601_v43, %v551_v57 }
 0x220   :  { %897 = vmatprep.subr.bf16.mxu0 %v863_v41  ;;  %938 = vmatprep.subr.bf16.mxu1 %v865_v14  ;;  %v869_v59 = vpack.c.bf16 %v603_v38, %v553_v0  ;;  %v552_v3 = vsel %vm549_vm11, %v2132_v16, %v2136_v34  ;;  %v550_v13 = vsel %vm549_vm11, %v2889_v52, %v2131_v51 }
 0x221   :  { %898 = vmatpush1.bf16.msra.mxu0 %v862_v37  ;;  %939 = vmatpush1.bf16.msra.mxu1 %v864_v53  ;;  %v689_v7 = vsel %vm687_vm0, %v2191_v11, %v2192_v32  ;;  %v866_v40 = vpack.c.bf16 %v600_v55, %v550_v13  ;;  %v868_v6 = vpack.c.bf16 %v602_v29, %v552_v3 }
 0x222   :  { %v2195_v8 = vpop.permute.xlu1 %2194  ;;  %v2200_v50 = vpop.permute.xlu0 %2199  ;;  %899 = vmatprep.subr.bf16.mxu0 %v867_v45  ;;  %940 = vmatprep.subr.bf16.mxu1 %v869_v59  ;;  %v739_v41 = vsel %vm737_vm14, %v2171_v17, %v2172_v22  ;;  %v740_v16 = vsel %vm737_vm14, %v2172_v22, %v2176_v46  ;;  %v688_v37 = vsel %vm687_vm0, %v2925_v33, %v2191_v11  ;;  %v821_v11 = vld [vmem:[#allocation6] sm:$0xf] }
 0x223   :  { %v2197_v43 = vunpack.i.h.bf16 %v2195_v8  ;;  %v2196_v10 = vunpack.i.l.bf16 %v2195_v8  ;;  %v2202_v19 = vunpack.i.h.bf16 %v2200_v50  ;;  %v2201_v34 = vunpack.i.l.bf16 %v2200_v50 }
 0x224   :  { %v871_v52 = vpack.c.bf16 %v739_v41, %v689_v7  ;;  %v741_v51 = vsel %vm737_vm14, %v2176_v46, %v2177_v31  ;;  %v738_v61 = vsel %vm737_vm14, %v728_v12, %v2171_v17 }
 0x225   :  { %v690_v60 = vsel %vm687_vm0, %v2192_v32, %v2196_v10  ;;  %900 = vmatpush1.bf16.msra.mxu0 %v866_v40  ;;  %941 = vmatpush1.bf16.msra.mxu1 %v868_v6  ;;  %v691_v57 = vsel %vm687_vm0, %v2196_v10, %v2197_v43  ;;  %v809_v0 = vsel %vm808_vm1, %v2201_v34, %v2202_v19 }
 0x226   :  { %v2205_v15 = vpop.permute.xlu1 %2204  ;;  %901 = vmatprep.subr.bf16.mxu0 %v871_v52  ;;  %v873_v36 = vpack.c.bf16 %v741_v51, %v691_v57  ;;  %v872_v22 = vpack.c.bf16 %v740_v16, %v690_v60  ;;  %v870_v33 = vpack.c.bf16 %v738_v61, %v688_v37  ;;  %v807_v42 = vpop.permute.xlu0 %806  ;;  %v874_v31 = vpack.c.bf16 %v809_v0, %v809_v0  ;;  %v993_v61 = vld [vmem:[%s3797_s3] sm:$0xff] }
 0x227   :  { %v2207_v47 = vunpack.i.h.bf16 %v2205_v15  ;;  %v2206_v38 = vunpack.i.l.bf16 %v2205_v15  ;;  %v994_v15 = vld [vmem:[%s3798_s4] sm:$0xff] }
 0x228   :  { %942 = vmatprep.subr.bf16.mxu1 %v873_v36  ;;  %v884_v29 = vsel %vm882_vm4, %v874_v31, 0  ;;  %v1077_v36 = vld [vmem:[%s3799_s5] sm:$0x3]  ;;  %s2365_s5 = smov [#allocation8]  }
 0x229   :  { %v812_v49 = vsel %vm808_vm1, %v2207_v47, %v807_v42  ;;  %902 = vmatpush1.bf16.msra.mxu0 %v870_v33  ;;  %943 = vmatpush1.bf16.msra.mxu1 %v872_v22  ;;  %v810_v14 = vsel %vm808_vm1, %v2202_v19, %v2206_v38  ;;  %v811_v53 = vsel %vm808_vm1, %v2206_v38, %v2207_v47  ;;  %v3932_v22 = vmov 2  }
 0x22a   :  { %v877_v17 = vpack.c.bf16 %v812_v49, %v812_v49  ;;  %v875_v12 = vpack.c.bf16 %v810_v14, %v810_v14  ;;  %v876_v55 = vpack.c.bf16 %v811_v53, %v811_v53  ;;  %v2360_v47 = vmov 4  }
 0x22b   :  { %v2361_v38 = vmov 5  }
 0x22c   :  { %2093 = vmatprep.subr.msk.bf16.mxu0 %vm882_vm4, %v875_v12  ;;  %2095 = vmatprep.subr.msk.bf16.mxu1 %vm882_vm4, %v877_v17  ;;  %v890_v32 = vsel %vm882_vm4, %v876_v55, 0 }
 0x22d   :  { %904 = vmatpush1.bf16.msra.mxu0 %v884_v29  ;;  %945 = vmatpush1.bf16.msra.mxu1 %v890_v32 }
 0x230   :  { %2094 = vmatmul.mubr.msk.bf16.vlgmr.msra.gmra.mrb[4].mxu0 %vm878_vm5, %v821_v11  ;;  %2096 = vmatmul.mubr.msk.bf16.vlgmr.msra.gmra.mrb[4].mxu1 %vm878_vm5, %v821_v11 }
 0x237   :  { %v979_v46 = vpop.permute.xlu1 %978  ;;  %v987_v45 = vpop.permute.xlu0 %986 }
 0x303   :  { %v929_v59 = vpop.f32.mrb[4].mxu0  ;;  %v970_v3 = vpop.f32.mrb[4].mxu1 }
 0x304   :  { %v981_v13 = vmul.f32 %v979_v46, %v929_v59  ;;  %v983_v7 = vmul.f32 %v979_v46, %v970_v3  ;;  %v931_v8 = vpop.f32.mrb[5].mxu0  ;;  %v972_v50 = vpop.f32.mrb[5].mxu1 }
 0x305   :  { %v982_v40 = vmul.f32 %v979_v46, %v931_v8  ;;  %v984_v6 = vmul.f32 %v979_v46, %v972_v50  ;;  %v933_v41 = vpop.f32.mrb[6].mxu0  ;;  %v974_v43 = vpop.f32.mrb[6].mxu1 }
 0x306   :  { %v934_v10 = vpop.f32.mrb[7].mxu0  ;;  %v975_v19 = vpop.f32.mrb[7].mxu1  ;;  %v2962_v34 = vadd.f32 %v987_v45, %v983_v7  ;;  %v2964_v16 = vadd.f32 %v987_v45, %v981_v13 }
 0x307   :  { %v2966_v37 = vadd.f32 %v987_v45, %v984_v6  ;;  %v2968_v52 = vadd.f32 %v987_v45, %v982_v40 }
 0x309   :  { %v1041_v51 = vadd.f32 %v2966_v37, %v2962_v34  ;;  %v995_v60 = vadd.f32 %v2968_v52, %v2964_v16  ;;  %v1045_v57 = vmax.f32 %v2962_v34, %v2966_v37  ;;  %v999_v0 = vmax.f32 %v2964_v16, %v2968_v52 }
 0x30b   :  { %1042 = vadd.xlane.f32.xlu0 %v1041_v51  ;;  %996 = vadd.xlane.f32.xlu1 %v995_v60 }
 0x30f   :  { %1046 = vmax.xlane.f32.xlu0 %v1045_v57  ;;  %1000 = vmax.xlane.f32.xlu1 %v999_v0 }
 0x320   :  { %1005 = vperm.xlu1 %2210, %v993_v61   ;;  %v2264_v61 = vld [vmem:[%s3801_s7] sm:$0xff]  ;;  %s2063_s7 = sshll.u32 %s2365_s5, 4  ;;  %s2064_s7 = int_to_ptr.vmem [resolvable:$true] %s2063_s7 }
 0x321   :  { %s2309_s1 = scalar_lea.vmem %s2064_s7, 512  ;;  %p2314_p3 = scmp.lt.s32.totalorder %s2064_s7, %s2064_s7 }
 0x322   :  { %p2310_p2 = scmp.ne.s32.totalorder %s2064_s7, %s2309_s1  ;;  %p2315_p4 = scmp.lt.s32.totalorder %s2309_s1, %s2309_s1 }
 0x324   :  { %2212 = vset.pattern.permute.xlu1 %v2360_v47  ;;  %p2316_p5 = por %p2315_p4, %p2314_p3 }
 0x325   :  { %1019 = vperm.xlu0 %2211, %v994_v15   ;;  %v3933_v15 = vmov 1  }
 0x326   :  { %p2317_p6 = pnand %p2316_p5, %p2310_p2 }
 0x329   :  { %1185 = vperm.xlu0 %2211, %v1077_v36  }
 0x32d   :  { %2215 = vset.pattern.permute.xlu0 %v3932_v22  ;;  %v3934_v22 = vmov 3  }
 0x32e   :  { %1341 = vperm.xlu0 %2215, %v1077_v36  }
 0x332   :  { %2218 = vset.pattern.permute.xlu0 %v2361_v38 }
 0x333   :  { %1615 = vperm.xlu0 %2218, %v1077_v36  }
 0x398   :  { %v1043_v33 = vpop.xlane.xlu0 %1042  ;;  %v997_v42 = vpop.xlane.xlu1 %996 }
 0x399   :  { %v1044_v14 = vmul.f32 0.00390625, %v1043_v33  ;;  %v998_v53 = vmul.f32 0.00390625, %v997_v42  ;;  %v2362_v33 = vmov 6   ;;  %v2363_v42 = vmov 7  }
 0x39c   :  { %v1001_v31 = vpop.xlane.xlu1 %1000  ;;  %v1047_v49 = vpop.xlane.xlu0 %1046 }
 0x39d   :  { %v1048_v17 = vsel %vm357_vm3, %v1044_v14, %v1047_v49  ;;  %v1002_v12 = vsel %vm357_vm3, %v998_v53, %v1001_v31  ;;  %v2364_v31 = vmov 8  }
 0x39e   :  { %2221 = vset.pattern.permute.xlu0 %v2364_v31 }
 0x39f   :  { %1912 = vperm.xlu0 %2221, %v1077_v36  }
 0x3a0   :  { %v1006_v55 = vpop.permute.xlu1 %1005 }
 0x3a1   :  { %v1008_v29 = vmul.f32 %v1006_v55, %v1002_v12  ;;  %v1049_v32 = vmul.f32 %v1048_v17, %v1006_v55 }
 0x3a3   :  { %v1009_v11 = vsel %vm407_vm7, %v1008_v29, 0.0  ;;  %v1050_v46 = vsel %vm407_vm7, %v1049_v32, 0.0 }
 0x3a4   :  { %v1010_v45 = vrot.slane %v1009_v11, 4  ;;  %v1051_v59 = vrot.slane %v1050_v46, 4  ;;  %v1020_v51 = vpop.permute.xlu0 %1019 }
 0x3a6   :  { %v1011_v3 = vadd.f32 %v1010_v45, %v1009_v11  ;;  %v1052_v13 = vadd.f32 %v1051_v59, %v1050_v46 }
 0x3a8   :  { %v1012_v7 = vrot.slane %v1011_v3, 2  ;;  %v1053_v8 = vrot.slane %v1052_v13, 2 }
 0x3aa   :  { %v1013_v50 = vadd.f32 %v1012_v7, %v1011_v3  ;;  %v1054_v40 = vadd.f32 %v1053_v8, %v1052_v13 }
 0x3ac   :  { %v1014_v6 = vrot.slane %v1013_v50, 1  ;;  %v1055_v41 = vrot.slane %v1054_v40, 1 }
 0x3ae   :  { %v1015_v43 = vadd.f32 %v1014_v6, %v1013_v50  ;;  %v1056_v10 = vadd.f32 %v1055_v41, %v1054_v40 }
 0x3b0   :  { %v1016_v19 = vmax.f32 %v1015_v43, 0.0  ;;  %v1057_v57 = vmax.f32 %v1056_v10, 0.0 }
 0x3b2   :  { %v1022_v60 = vmul.f32 %v1020_v51, %v1016_v19  ;;  %v1058_v0 = vmul.f32 %v1057_v57, %v1020_v51 }
 0x3b4   :  { %1025 = vrot.lane.b32.xlu1 %v1022_v60, %s2351_s25 }
 0x3b8   :  { %1061 = vrot.lane.b32.xlu1 %v1058_v0, %s2351_s25 }
 0x3bc   :  { %257 = vperm.xlu1 %2212, %v2264_v61  }
 0x3c0   :  { %2213 = vset.pattern.permute.xlu1 %v2361_v38 }
 0x3c1   :  { %265 = vperm.xlu1 %2213, %v2264_v61  }
 0x3c5   :  { %2214 = vset.pattern.permute.xlu1 %v3933_v15 }
 0x3c6   :  { %1242 = vperm.xlu1 %2214, %v1077_v36  }
 0x3ca   :  { %2216 = vset.pattern.permute.xlu1 %v3934_v22 }
 0x3cb   :  { %1440 = vperm.xlu1 %2216, %v1077_v36  }
 0x3cf   :  { %2217 = vset.pattern.permute.xlu1 %v2360_v47 }
 0x3d0   :  { %1529 = vperm.xlu1 %2217, %v1077_v36  }
 0x3d4   :  { %2219 = vset.pattern.permute.xlu1 %v2362_v33 }
 0x3d5   :  { %1714 = vperm.xlu1 %2219, %v1077_v36  }
 0x3d9   :  { %2220 = vset.pattern.permute.xlu1 %v2363_v42 }
 0x3da   :  { %1813 = vperm.xlu1 %2220, %v1077_v36  }
 0x3de   :  { %2222 = vset.pattern.permute.xlu1 %v3931_v58 }
 0x426   :  { %v1026_v38 = vpop.permute.xlu1 %1025 }
 0x427   :  { %v1028_v49 = vadd.f32 %v1026_v38, %v1022_v60 }
 0x429   :  { %v1029_v14 = vsub.f32 0.0, %v1028_v49 }
 0x42a   :  { %v1062_v53 = vpop.permute.xlu1 %1061 }
 0x42b   :  { %v1030_v17 = vmul.f32 1.442695, %v1029_v14  ;;  %v1064_v12 = vadd.f32 %v1062_v53, %v1058_v0 }
 0x42d   :  { %2240 = vpow2.f32 %v1030_v17  ;;  %v1065_v47 = vsub.f32 0.0, %v1064_v12 }
 0x42f   :  { %v1066_v55 = vmul.f32 1.442695, %v1065_v47 }
 0x431   :  { %2242 = vpow2.f32 %v1066_v55 }
 0x437   :  { %v2241_v29 = vpop.eup %2240 }
 0x438   :  { %v1032_v32 = vadd.f32 1.0, %v2241_v29 }
 0x43a   :  { %2244 = vrcp.f32 %v1032_v32 }
 0x43b   :  { %v2243_v11 = vpop.eup %2242  ;;  %v3000_v58 = vpop.permute.xlu1 %257 }
 0x43c   :  { %v1068_v46 = vadd.f32 1.0, %v2243_v11  ;;  %3935 = vst [vmem:[#allocation52_spill] sm:$0xff] %v3000_v58 }
 0x43e   :  { %2246 = vrcp.f32 %v1068_v46 }
 0x440   :  { %v3002_v59 = vpop.permute.xlu1 %265 }
 0x441   :  { %3936 = vst [vmem:[#allocation53_spill] sm:$0xff] %v3002_v59 }
 0x444   :  { %v2245_v45 = vpop.eup %2244 }
 0x445   :  { %1036 = vperm.xlu1 %2222, %v2245_v45   ;;  %v3004_v3 = vpop.permute.xlu1 %1242 }
 0x448   :  { %v2247_v36 = vpop.eup %2246 }
 0x449   :  { %1072 = vperm.xlu1 %2222, %v2247_v36  }
 0x44a   :  { %v3006_v13 = vpop.permute.xlu1 %1440 }
 0x44f   :  { %v3008_v7 = vpop.permute.xlu1 %1529 }
 0x454   :  { %v3010_v8 = vpop.permute.xlu1 %1714 }
 0x459   :  { %v3012_v50 = vpop.permute.xlu1 %1813 }
 0x4c4   :  { %v1037_v40 = vpop.permute.xlu1 %1036 }
 0x4c5   :  { %v3015_v6 = vmul.f32 %v1037_v40, %v2964_v16  ;;  %v3018_v41 = vmul.f32 %v1037_v40, %v2968_v52 }
 0x4c7   :  { %3937 = vst [vmem:[#allocation54_spill] sm:$0xff] %v3015_v6  ;;  %3938 = vst [vmem:[#allocation55_spill] sm:$0xff] %v3018_v41  ;;  %v1078_v43 = vrot.slane %v3015_v6, 4  ;;  %v1084_v10 = vrot.slane %v3018_v41, 4 }
 0x4c8   :  { %v1073_v19 = vpop.permute.xlu1 %1072 }
 0x4c9   :  { %v1079_v51 = vadd.f32 %v1078_v43, %v3015_v6  ;;  %v1085_v60 = vadd.f32 %v1084_v10, %v3018_v41  ;;  %v1136_v57 = vmax.f32 %v3018_v41, %v1084_v10  ;;  %v3026_v0 = vmul.f32 %v1073_v19, %v2962_v34 }
 0x4ca   :  { %v3029_v16 = vmul.f32 %v1073_v19, %v2966_v37  ;;  %v1130_v52 = vmax.f32 %v3015_v6, %v1078_v43 }
 0x4cb   :  { %3939 = vst [vmem:[#allocation56_spill] sm:$0xff] %v3026_v0  ;;  %v1080_v61 = vrot.slane %v1079_v51, 2  ;;  %v1090_v15 = vrot.slane %v3026_v0, 4  ;;  %v1137_v22 = vrot.slane %v1136_v57, 2  ;;  %v1086_v31 = vrot.slane %v1085_v60, 2 }
 0x4cc   :  { %3940 = vst [vmem:[#allocation57_spill] sm:$0xff] %v3029_v16  ;;  %v1096_v33 = vrot.slane %v3029_v16, 4  ;;  %v1131_v42 = vrot.slane %v1130_v52, 2 }
 0x4cd   :  { %v1138_v38 = vmax.f32 %v1136_v57, %v1137_v22  ;;  %v1142_v49 = vmax.f32 %v3026_v0, %v1090_v15  ;;  %v1091_v14 = vadd.f32 %v1090_v15, %v3026_v0  ;;  %v1081_v17 = vadd.f32 %v1080_v61, %v1079_v51 }
 0x4ce   :  { %v1097_v34 = vadd.f32 %v1096_v33, %v3029_v16  ;;  %v1148_v37 = vmax.f32 %v3029_v16, %v1096_v33  ;;  %v1132_v53 = vmax.f32 %v1130_v52, %v1131_v42  ;;  %v1087_v36 = vadd.f32 %v1086_v31, %v1085_v60 }
 0x4cf   :  { %v1139_v12 = vrot.slane %v1138_v38, 1  ;;  %v1143_v47 = vrot.slane %v1142_v49, 2  ;;  %v1092_v55 = vrot.slane %v1091_v14, 2  ;;  %v1082_v19 = vrot.slane %v1081_v17, 1 }
 0x4d0   :  { %v1133_v29 = vrot.slane %v1132_v53, 1  ;;  %v1149_v32 = vrot.slane %v1148_v37, 2  ;;  %v1098_v40 = vrot.slane %v1097_v34, 2  ;;  %v1088_v61 = vrot.slane %v1087_v36, 1 }
 0x4d1   :  { %v1140_v11 = vmax.f32 %v1138_v38, %v1139_v12  ;;  %v1144_v46 = vmax.f32 %v1142_v49, %v1143_v47  ;;  %v1093_v45 = vadd.f32 %v1092_v55, %v1091_v14  ;;  %v1083_v33 = vadd.f32 %v1082_v19, %v1081_v17 }
 0x4d2   :  { %v1134_v43 = vmax.f32 %v1132_v53, %v1133_v29  ;;  %v1150_v10 = vmax.f32 %v1148_v37, %v1149_v32  ;;  %v1099_v38 = vadd.f32 %v1098_v40, %v1097_v34  ;;  %v1089_v49 = vadd.f32 %v1088_v61, %v1087_v36  ;;  %v3046_v34 = vpop.permute.xlu0 %1185 }
 0x4d3   :  { %1159 = vrot.lane.b32.xlu1 %v1140_v11, %s2348_s16  ;;  %v1145_v57 = vrot.slane %v1144_v46, 1  ;;  %v1094_v15 = vrot.slane %v1093_v45, 1  ;;  %v1103_v60 = vmul.f32 0.125, %v1083_v33 }
 0x4d4   :  { %1157 = vrot.lane.b32.xlu0 %v1134_v43, %s2348_s16  ;;  %v1151_v51 = vrot.slane %v1150_v10, 1  ;;  %v1100_v14 = vrot.slane %v1099_v38, 1  ;;  %v1104_v37 = vmul.f32 0.125, %v1089_v49 }
 0x4d5   :  { %v1146_v52 = vmax.f32 %v1144_v46, %v1145_v57  ;;  %v1095_v42 = vadd.f32 %v1094_v15, %v1093_v45 }
 0x4d6   :  { %v1152_v22 = vmax.f32 %v1150_v10, %v1151_v51  ;;  %v1101_v53 = vadd.f32 %v1100_v14, %v1099_v38  ;;  %v3048_v17 = vpop.permute.xlu0 %1341 }
 0x4d7   :  { %v1105_v31 = vmul.f32 0.125, %v1095_v42 }
 0x4d8   :  { %1163 = vrot.lane.b32.xlu1 %v1152_v22, %s2348_s16  ;;  %1161 = vrot.lane.b32.xlu0 %v1146_v52, %s2348_s16  ;;  %v1106_v12 = vmul.f32 0.125, %v1101_v53 }
 0x4da   :  { %v3050_v47 = vpop.permute.xlu0 %1615 }
 0x4dc   :  { %1111 = vrot.lane.b32.xlu1 %v1103_v60, %s2348_s16  ;;  %1115 = vrot.lane.b32.xlu0 %v1105_v31, %s2348_s16 }
 0x4de   :  { %v3052_v55 = vpop.permute.xlu0 %1912 }
 0x4df   :  { %3941 = vst [vmem:[#allocation58_spill] sm:$0xff] %v3052_v55 }
 0x4e0   :  { %1113 = vrot.lane.b32.xlu1 %v1104_v37, %s2348_s16 }
 0x4e4   :  { %1117 = vrot.lane.b32.xlu1 %v1106_v12, %s2348_s16 }
 0x545   :  { %v1160_v29 = vpop.permute.xlu1 %1159 }
 0x546   :  { %v1158_v32 = vpop.permute.xlu0 %1157 }
 0x547   :  { %v3055_v11 = vsel %vm284_vm2, 0.0, %v1158_v32  ;;  %v3058_v46 = vsel %vm284_vm2, %v1158_v32, %v1160_v29 }
 0x548   :  { %v1566_v45 = vrot.slane %v3055_v11, 7  ;;  %v1567_v36 = vrot.slane %v3058_v46, 7  ;;  %v1278_v51 = vmul.f32 %v3058_v46, %v2658_v63  ;;  %v1277_v33 = vmul.f32 %v3055_v11, %v2546_v5 }
 0x549   :  { %v1476_v49 = vmul.f32 %v3058_v46, %v2643_v4 }
 0x54a   :  { %1571 = vrot.lane.b32.xlu1 %v1566_v45, %s2350_s24  ;;  %v1162_v40 = vpop.permute.xlu0 %1161  ;;  %1573 = vrot.lane.b32.xlu0 %v1567_v36, %s2350_s24  ;;  %v1164_v43 = vpop.permute.xlu1 %1163  ;;  %v1288_v22 = vrot.slane %v1278_v51, 7  ;;  %v1287_v38 = vrot.slane %v1277_v33, 7 }
 0x54b   :  { %v3065_v10 = vsel %vm284_vm2, %v1160_v29, %v1162_v40  ;;  %v3068_v19 = vsel %vm284_vm2, %v1162_v40, %v1164_v43  ;;  %v3075_v52 = vsel %vm284_vm2, %v1164_v43, 0.0  ;;  %v1486_v53 = vrot.slane %v1476_v49, 7 }
 0x54c   :  { %v1568_v57 = vrot.slane %v3065_v10, 7  ;;  %v1569_v15 = vrot.slane %v3068_v19, 7  ;;  %v1570_v61 = vrot.slane %v3075_v52, 7  ;;  %v1280_v42 = vmul.f32 %v3068_v19, %v2629_v62 }
 0x54d   :  { %v1279_v31 = vmul.f32 %v3065_v10, %v2663_v20  ;;  %v1281_v12 = vmul.f32 %v3075_v52, %v2554_v9  ;;  %v1478_v29 = vmul.f32 %v3068_v19, %v2690_v26  ;;  %v1475_v40 = vmul.f32 %v3055_v11, %v2572_v18 }
 0x54e   :  { %1575 = vrot.lane.b32.xlu1 %v1568_v57, %s2350_s24  ;;  %1577 = vrot.lane.b32.xlu0 %v1569_v15, %s2350_s24  ;;  %v1290_v60 = vrot.slane %v1280_v42, 7  ;;  %v1112_v14 = vpop.permute.xlu1 %1111  ;;  %v1116_v57 = vpop.permute.xlu0 %1115 }
 0x54f   :  { %v1289_v37 = vrot.slane %v1279_v31, 7  ;;  %v1291_v45 = vrot.slane %v1281_v12, 7  ;;  %v1488_v36 = vrot.slane %v1478_v29, 7  ;;  %v3101_v43 = vsel %vm284_vm2, 0.0, %v1112_v14 }
 0x550   :  { %v1485_v15 = vrot.slane %v1475_v40, 7  ;;  %v1532_v51 = vmul.f32 %v3008_v7, %v3101_v43 }
 0x552   :  { %1579 = vrot.lane.b32.xlu1 %v1570_v61, %s2350_s24  ;;  %1294 = vrot.lane.b32.xlu0 %v1288_v22, %s2351_s25  ;;  %v1114_v32 = vpop.permute.xlu1 %1113  ;;  %v1477_v61 = vmul.f32 %v3065_v10, %v2647_v48 }
 0x553   :  { %v3110_v22 = vsel %vm284_vm2, %v1114_v32, %v1116_v57  ;;  %v3128_v12 = vsel %vm284_vm2, %v1112_v14, %v1114_v32 }
 0x554   :  { %v1487_v42 = vrot.slane %v1477_v61, 7  ;;  %v1533_v29 = vmul.f32 %v3008_v7, %v3128_v12 }
 0x556   :  { %1292 = vrot.lane.b32.xlu1 %v1287_v38, %s2351_s25  ;;  %1298 = vrot.lane.b32.xlu0 %v1290_v60, %s2351_s25  ;;  %v1118_v33 = vpop.permute.xlu1 %1117  ;;  %v1534_v38 = vmul.f32 %v3008_v7, %v3110_v22  ;;  %v1479_v60 = vmul.f32 %v3075_v52, %v2576_v23 }
 0x557   :  { %v3119_v31 = vsel %vm284_vm2, %v1116_v57, %v1118_v33  ;;  %v3137_v40 = vsel %vm284_vm2, %v1118_v33, 0.0  ;;  %v1651_v57 = vmul.f32 %v3058_v46, %v2669_v1  ;;  %v1653_v33 = vmul.f32 %v3068_v19, %v2717_v27 }
 0x558   :  { %v1489_v49 = vrot.slane %v1479_v60, 7  ;;  %v1536_v14 = vmul.f32 %v3008_v7, %v3137_v40  ;;  %v3942_v60 = vld [vmem:[#allocation29_spill] sm:$0xff] }
 0x55a   :  { %1296 = vrot.lane.b32.xlu1 %v1289_v37, %s2351_s25  ;;  %1492 = vrot.lane.b32.xlu0 %v1486_v53, %s2352_s26  ;;  %v1535_v37 = vmul.f32 %v3008_v7, %v3119_v31  ;;  %v1650_v53 = vmul.f32 %v3055_v11, %v2578_v25 }
 0x55e   :  { %1300 = vrot.lane.b32.xlu1 %v1291_v45, %s2351_s25  ;;  %1496 = vrot.lane.b32.xlu0 %v1488_v36, %s2352_s26  ;;  %v1660_v45 = vrot.slane %v1650_v53, 7  ;;  %v1652_v36 = vmul.f32 %v3065_v10, %v2673_v2  ;;  %v1196_v53 = vmul.f32 %v3055_v11, %v2452_v21 }
 0x560   :  { %v1662_v32 = vrot.slane %v1652_v36, 7  ;;  %v1176_v36 = vmul.f32 %v3128_v12, %v2469_v28 }
 0x562   :  { %1490 = vrot.lane.b32.xlu1 %v1485_v15, %s2352_s26  ;;  %1542 = vrot.lane.b32.xlu0 %v1532_v51, %s2350_s24  ;;  %v1654_v15 = vmul.f32 %v3075_v52, %v2582_v30  ;;  %v1661_v51 = vrot.slane %v1651_v57, 7 }
 0x564   :  { %v1664_v61 = vrot.slane %v1654_v15, 7  ;;  %v1200_v15 = vmul.f32 %v1196_v53, %v2495_v35 }
 0x566   :  { %1494 = vrot.lane.b32.xlu1 %v1487_v42, %s2352_s26  ;;  %1546 = vrot.lane.b32.xlu0 %v1534_v38, %s2350_s24  ;;  %v1848_v42 = vmul.f32 %v3055_v11, %v2600_v44  ;;  %v1849_v38 = vmul.f32 %v3058_v46, %v2694_v54 }
 0x56a   :  { %1498 = vrot.lane.b32.xlu1 %v1489_v49, %s2352_s26  ;;  %1548 = vrot.lane.b32.xlu0 %v1535_v37, %s2350_s24  ;;  %v1850_v49 = vmul.f32 %v3065_v10, %v3942_v60  ;;  %v1175_v37 = vmul.f32 %v3101_v43, %v2452_v21  ;;  %v1851_v21 = vmul.f32 %v3068_v19, %v2740_v56 }
 0x56c   :  { %v1179_v57 = vmul.f32 %v1175_v37, %v2495_v35  ;;  %v1177_v37 = vmul.f32 %v3110_v22, %v2461_v24  ;;  %v1198_v35 = vmul.f32 %v3065_v10, %v2461_v24  ;;  %v1861_v6 = vrot.slane %v1851_v21, 7 }
 0x56e   :  { %1544 = vrot.lane.b32.xlu1 %v1533_v29, %s2350_s24  ;;  %1665 = vrot.lane.b32.xlu0 %v1660_v45, %s2353_s27  ;;  %v1663_v29 = vrot.slane %v1653_v33, 7  ;;  %v1858_v45 = vrot.slane %v1848_v42, 7  ;;  %v3943_v42 = vld [vmem:[#allocation28_spill] sm:$0xff]  ;;  %v1188_v53 = vmul.f32 %v3046_v34, %v1179_v57  ;;  %v3946_v57 = vld [vmem:[#allocation15_spill] sm:$0xff] }
 0x572   :  { %1550 = vrot.lane.b32.xlu1 %v1536_v14, %s2350_s24  ;;  %1669 = vrot.lane.b32.xlu0 %v1662_v32, %s2353_s27  ;;  %v1197_v14 = vmul.f32 %v3058_v46, %v2469_v28  ;;  %v1859_v32 = vrot.slane %v1849_v38, 7  ;;  %v1852_v28 = vmul.f32 %v3075_v52, %v3943_v42  ;;  %v1208_v38 = vrot.slane %v1200_v15, 7  ;;  %v3945_v15 = vld [vmem:[#allocation14_spill] sm:$0xff] }
 0x573   :  { %v1181_v16 = vmul.f32 %v1177_v37, %v3945_v15  ;;  %v1202_v0 = vmul.f32 %v1198_v35, %v3945_v15  ;;  %v1236_v37 = vmul.f32 %v3101_v43, %v2546_v5  ;;  %v1238_v5 = vmul.f32 %v3110_v22, %v2663_v20  ;;  %v3948_v20 = vld [vmem:[#allocation31_spill] sm:$0xff] }
 0x574   :  { %v1201_v33 = vmul.f32 %v1197_v14, %v2511_v39  ;;  %v1862_v59 = vrot.slane %v1852_v28, 7  ;;  %v3947_v28 = vld [vmem:[#allocation20_spill] sm:$0xff] }
 0x576   :  { %1667 = vrot.lane.b32.xlu1 %v1661_v51, %s2353_s27  ;;  %1673 = vrot.lane.b32.xlu0 %v1664_v61, %s2353_s27  ;;  %v1860_v51 = vrot.slane %v1850_v49, 7  ;;  %v1180_v61 = vmul.f32 %v1176_v36, %v2511_v39  ;;  %v1209_v49 = vrot.slane %v1201_v33, 7  ;;  %v1216_v39 = vmul.f32 %v1208_v38, %v3046_v34 }
 0x577   :  { %v1237_v38 = vmul.f32 %v3128_v12, %v2658_v63 }
 0x578   :  { %v1189_v14 = vmul.f32 %v3046_v34, %v1180_v61  ;;  %v1217_v24 = vmul.f32 %v1209_v49, %v3046_v34  ;;  %v1210_v61 = vrot.slane %v1202_v0, 7 }
 0x57a   :  { %1671 = vrot.lane.b32.xlu1 %v1663_v29, %s2353_s27  ;;  %1863 = vrot.lane.b32.xlu0 %v1858_v45, %s2354_s29  ;;  %v3944_v29 = vld [vmem:[#allocation13_spill] sm:$0xff]  ;;  %v1225_v35 = vrot.slane %v1217_v24, 1  ;;  %v1218_v49 = vmul.f32 %v1210_v61, %v3046_v34  ;;  %v3951_v61 = vld [vmem:[#allocation35_spill] sm:$0xff] }
 0x57b   :  { %v1199_v45 = vmul.f32 %v3068_v19, %v3944_v29  ;;  %v1178_v36 = vmul.f32 %v3119_v31, %v3944_v29  ;;  %v1224_v29 = vrot.slane %v1216_v39, 1 }
 0x57c   :  { %v3205_v21 = vadd.f32 %v1225_v35, %v1189_v14  ;;  %v3949_v14 = vld [vmem:[#allocation33_spill] sm:$0xff]  ;;  %v3952_v35 = vld [vmem:[#allocation36_spill] sm:$0xff] }
 0x57d   :  { %v1203_v33 = vmul.f32 %v1199_v45, %v3946_v57  ;;  %v1182_v41 = vmul.f32 %v1178_v36, %v3946_v57  ;;  %v3199_v15 = vadd.f32 %v1224_v29, %v1188_v53  ;;  %v1376_v53 = vmul.f32 %v3055_v11, %v3947_v28 }
 0x57e   :  { %1865 = vrot.lane.b32.xlu1 %v1859_v32, %s2354_s29  ;;  %1867 = vrot.lane.b32.xlu0 %v1860_v51, %s2354_s29  ;;  %v1190_v51 = vmul.f32 %v3046_v34, %v1181_v16  ;;  %v1226_v45 = vrot.slane %v1218_v49, 1  ;;  %v1246_v16 = vmul.f32 %v3004_v3, %v1237_v38  ;;  %v1245_v36 = vmul.f32 %v3004_v3, %v1236_v37  ;;  %v3950_v38 = vld [vmem:[#allocation22_spill] sm:$0xff] }
 0x57f   :  { %v1211_v32 = vrot.slane %v1203_v33, 7  ;;  %v1191_v0 = vmul.f32 %v3046_v34, %v1182_v41  ;;  %v1378_v24 = vmul.f32 %v3065_v10, %v3949_v14  ;;  %v1247_v57 = vmul.f32 %v3004_v3, %v1238_v5  ;;  %v3954_v5 = vld [vmem:[#allocation21_spill] sm:$0xff] }
 0x580   :  { %v3217_v39 = vadd.f32 %v1226_v45, %v1190_v51  ;;  %v1381_v29 = vmul.f32 %v1376_v53, %v3950_v38  ;;  %v1380_v45 = vmul.f32 %v3075_v52, %v3954_v5 }
 0x581   :  { %v1219_v63 = vmul.f32 %v1211_v32, %v3046_v34  ;;  %v1377_v34 = vmul.f32 %v3058_v46, %v3948_v20  ;;  %v1383_v32 = vmul.f32 %v1378_v24, %v3952_v35 }
 0x582   :  { %1869 = vrot.lane.b32.xlu1 %v1861_v6, %s2354_s29  ;;  %1871 = vrot.lane.b32.xlu0 %v1862_v59, %s2354_s29  ;;  %v1239_v59 = vmul.f32 %v3119_v31, %v2629_v62  ;;  %v1240_v62 = vmul.f32 %v3137_v40, %v2554_v9  ;;  %v1391_v49 = vrot.slane %v1381_v29, 7 }
 0x583   :  { %v1227_v6 = vrot.slane %v1219_v63, 1  ;;  %v1382_v37 = vmul.f32 %v1377_v34, %v3951_v61  ;;  %v3953_v63 = vld [vmem:[#allocation32_spill] sm:$0xff]  ;;  %v1393_v53 = vrot.slane %v1383_v32, 7  ;;  %v1437_v32 = vmul.f32 %v3119_v31, %v2690_v26 }
 0x584   :  { %v1248_v33 = vmul.f32 %v3004_v3, %v1239_v59  ;;  %v1249_v51 = vmul.f32 %v3004_v3, %v1240_v62  ;;  %v3956_v59 = vld [vmem:[#allocation23_spill] sm:$0xff] }
 0x585   :  { %v3221_v41 = vadd.f32 %v1227_v6, %v1191_v0  ;;  %v1379_v0 = vmul.f32 %v3068_v19, %v3953_v63  ;;  %v1392_v9 = vrot.slane %v1382_v37, 7  ;;  %v1385_v6 = vmul.f32 %v1380_v45, %v3956_v59 }
 0x586   :  { %1257 = vrot.lane.b32.xlu1 %v1246_v16, %s2351_s25  ;;  %1255 = vrot.lane.b32.xlu0 %v1245_v36, %s2351_s25  ;;  %v3955_v16 = vld [vmem:[#allocation37_spill] sm:$0xff]  ;;  %v1436_v37 = vmul.f32 %v3110_v22, %v2647_v48  ;;  %v1611_v45 = vmul.f32 %v3110_v22, %v2673_v2 }
 0x587   :  { %v1384_v36 = vmul.f32 %v1379_v0, %v3955_v16  ;;  %v1395_v24 = vrot.slane %v1385_v6, 7  ;;  %v1610_v0 = vmul.f32 %v3128_v12, %v2669_v1  ;;  %v3958_v6 = vld [vmem:[#allocation38_spill] sm:$0xff] }
 0x588   :  { %v1750_v2 = vmul.f32 %v3058_v46, %v3958_v6 }
 0x589   :  { %v1394_v34 = vrot.slane %v1384_v36, 7  ;;  %v3957_v36 = vld [vmem:[#allocation24_spill] sm:$0xff] }
 0x58a   :  { %1259 = vrot.lane.b32.xlu0 %v1247_v57, %s2351_s25  ;;  %1261 = vrot.lane.b32.xlu1 %v1248_v33, %s2351_s25  ;;  %v1434_v57 = vmul.f32 %v3101_v43, %v2572_v18  ;;  %v1435_v33 = vmul.f32 %v3128_v12, %v2643_v4  ;;  %v1445_v18 = vmul.f32 %v3006_v13, %v1436_v37  ;;  %v3962_v37 = vld [vmem:[#allocation41_spill] sm:$0xff] }
 0x58b   :  { %v1446_v4 = vmul.f32 %v3006_v13, %v1437_v32  ;;  %v1749_v1 = vmul.f32 %v3055_v11, %v3957_v36  ;;  %v1752_v32 = vmul.f32 %v3068_v19, %v3962_v37 }
 0x58c   :  { %v1443_v62 = vmul.f32 %v3006_v13, %v1434_v57  ;;  %v1444_v29 = vmul.f32 %v3006_v13, %v1435_v33  ;;  %v3960_v57 = vld [vmem:[#allocation26_spill] sm:$0xff] }
 0x58d   :  { %v1754_v33 = vmul.f32 %v1749_v1, %v3960_v57  ;;  %v1807_v1 = vmul.f32 %v3101_v43, %v2600_v44  ;;  %v1810_v44 = vmul.f32 %v3119_v31, %v2740_v56  ;;  %v1332_v56 = vmul.f32 %v3110_v22, %v3949_v14 }
 0x58e   :  { %1263 = vrot.lane.b32.xlu0 %v1249_v51, %s2351_s25  ;;  %1396 = vrot.lane.b32.xlu1 %v1391_v49, %s2355_s0  ;;  %v1438_v51 = vmul.f32 %v3137_v40, %v2576_v23  ;;  %v1609_v49 = vmul.f32 %v3101_v43, %v2578_v25  ;;  %v1612_v23 = vmul.f32 %v3119_v31, %v2717_v27  ;;  %v3959_v27 = vld [vmem:[#allocation39_spill] sm:$0xff] }
 0x58f   :  { %v1613_v25 = vmul.f32 %v3137_v40, %v2582_v30  ;;  %v1337_v14 = vmul.f32 %v1332_v56, %v3952_v35 }
 0x590   :  { %v1447_v48 = vmul.f32 %v3006_v13, %v1438_v51  ;;  %v1618_v26 = vmul.f32 %v3050_v47, %v1609_v49  ;;  %v1764_v51 = vrot.slane %v1754_v33, 7 }
 0x591   :  { %v1622_v30 = vmul.f32 %v3050_v47, %v1613_v25 }
 0x592   :  { %1398 = vrot.lane.b32.xlu0 %v1392_v9, %s2355_s0  ;;  %1400 = vrot.lane.b32.xlu1 %v1393_v53, %s2355_s0  ;;  %v1619_v9 = vmul.f32 %v3050_v47, %v1610_v0  ;;  %v1620_v53 = vmul.f32 %v3050_v47, %v1611_v45  ;;  %v3965_v0 = vld [vmem:[#allocation25_spill] sm:$0xff] }
 0x593   :  { %v1753_v45 = vmul.f32 %v3075_v52, %v3965_v0 }
 0x596   :  { %1402 = vrot.lane.b32.xlu0 %v1394_v34, %s2355_s0  ;;  %1404 = vrot.lane.b32.xlu1 %v1395_v24, %s2355_s0  ;;  %v1621_v34 = vmul.f32 %v3050_v47, %v1612_v23  ;;  %v1751_v24 = vmul.f32 %v3065_v10, %v3959_v27 }
 0x59a   :  { %1453 = vrot.lane.b32.xlu0 %v1443_v62, %s2352_s26  ;;  %1455 = vrot.lane.b32.xlu1 %v1444_v29, %s2352_s26  ;;  %v3961_v62 = vld [vmem:[#allocation42_spill] sm:$0xff] }
 0x59b   :  { %v1755_v29 = vmul.f32 %v1750_v2, %v3961_v62  ;;  %v1808_v2 = vmul.f32 %v3128_v12, %v2694_v54  ;;  %v1811_v54 = vmul.f32 %v3137_v40, %v3943_v42  ;;  %v3969_v42 = vld [vmem:[#allocation40_spill] sm:$0xff] }
 0x59d   :  { %v1765_v49 = vrot.slane %v1755_v29, 7  ;;  %v1817_v33 = vmul.f32 %v3012_v50, %v1808_v2  ;;  %v1334_v2 = vmul.f32 %v3137_v40, %v3954_v5  ;;  %v3971_v5 = vld [vmem:[#allocation46_spill] sm:$0xff] }
 0x59e   :  { %1457 = vrot.lane.b32.xlu0 %v1445_v18, %s2352_s26  ;;  %1459 = vrot.lane.b32.xlu1 %v1446_v4, %s2352_s26  ;;  %v3963_v18 = vld [vmem:[#allocation43_spill] sm:$0xff] }
 0x59f   :  { %v1756_v4 = vmul.f32 %v1751_v24, %v3963_v18  ;;  %v1816_v24 = vmul.f32 %v3012_v50, %v1807_v1  ;;  %v1339_v35 = vmul.f32 %v1334_v2, %v3956_v59  ;;  %v3972_v59 = vld [vmem:[#allocation50_spill] sm:$0xff]  ;;  %v3974_v2 = vld [vmem:[#allocation47_spill] sm:$0xff] }
 0x5a1   :  { %v1766_v23 = vrot.slane %v1756_v4, 7 }
 0x5a2   :  { %1461 = vrot.lane.b32.xlu0 %v1447_v48, %s2352_s26  ;;  %1628 = vrot.lane.b32.xlu1 %v1618_v26, %s2353_s27  ;;  %v3964_v48 = vld [vmem:[#allocation48_spill] sm:$0xff] }
 0x5a3   :  { %v1757_v26 = vmul.f32 %v1752_v32, %v3964_v48  ;;  %v3967_v32 = vld [vmem:[#allocation30_spill] sm:$0xff] }
 0x5a4   :  { %v1947_v4 = vmul.f32 %v3055_v11, %v3967_v32 }
 0x5a5   :  { %v1767_v25 = vrot.slane %v1757_v26, 7 }
 0x5a6   :  { %1630 = vrot.lane.b32.xlu0 %v1619_v9, %s2353_s27  ;;  %1632 = vrot.lane.b32.xlu1 %v1620_v53, %s2353_s27  ;;  %v3966_v9 = vld [vmem:[#allocation27_spill] sm:$0xff] }
 0x5a7   :  { %v1758_v53 = vmul.f32 %v1753_v45, %v3966_v9 }
 0x5aa   :  { %1634 = vrot.lane.b32.xlu0 %v1621_v34, %s2353_s27  ;;  %1636 = vrot.lane.b32.xlu1 %v1622_v30, %s2353_s27  ;;  %v1768_v34 = vrot.slane %v1758_v53, 7  ;;  %v1809_v30 = vmul.f32 %v3110_v22, %v3942_v60  ;;  %v3970_v53 = vld [vmem:[#allocation45_spill] sm:$0xff] }
 0x5ac   :  { %v1818_v29 = vmul.f32 %v3012_v50, %v1809_v30 }
 0x5ae   :  { %1769 = vrot.lane.b32.xlu0 %v1764_v51, %s2356_s28  ;;  %1771 = vrot.lane.b32.xlu1 %v1765_v49, %s2356_s28  ;;  %v3968_v51 = vld [vmem:[#allocation44_spill] sm:$0xff]  ;;  %v1819_v49 = vmul.f32 %v3012_v50, %v1810_v44 }
 0x5af   :  { %v1948_v60 = vmul.f32 %v3058_v46, %v3968_v51  ;;  %v1330_v46 = vmul.f32 %v3101_v43, %v3947_v28  ;;  %v1331_v28 = vmul.f32 %v3128_v12, %v3948_v20 }
 0x5b1   :  { %v1953_v11 = vmul.f32 %v1948_v60, %v3970_v53  ;;  %v1335_v44 = vmul.f32 %v1330_v46, %v3950_v38  ;;  %v1336_v56 = vmul.f32 %v1331_v28, %v3951_v61 }
 0x5b2   :  { %1773 = vrot.lane.b32.xlu0 %v1766_v23, %s2356_s28  ;;  %1775 = vrot.lane.b32.xlu1 %v1767_v25, %s2356_s28  ;;  %v1820_v23 = vmul.f32 %v3012_v50, %v1811_v54  ;;  %v1952_v25 = vmul.f32 %v1947_v4, %v3969_v42  ;;  %v1949_v4 = vmul.f32 %v3065_v10, %v3971_v5 }
 0x5b3   :  { %v1344_v20 = vmul.f32 %v3048_v17, %v1335_v44  ;;  %v1348_v10 = vmul.f32 %v3048_v17, %v1339_v35  ;;  %v1345_v46 = vmul.f32 %v3048_v17, %v1336_v56  ;;  %v3975_v35 = vld [vmem:[#allocation49_spill] sm:$0xff]  ;;  %v1706_v56 = vmul.f32 %v3119_v31, %v3962_v37 }
 0x5b4   :  { %v1962_v30 = vrot.slane %v1952_v25, 7  ;;  %v1902_v37 = vmul.f32 %v3128_v12, %v3968_v51 }
 0x5b6   :  { %1777 = vrot.lane.b32.xlu0 %v1768_v34, %s2356_s28  ;;  %1826 = vrot.lane.b32.xlu1 %v1816_v24, %s2354_s29 }
 0x5ba   :  { %1828 = vrot.lane.b32.xlu0 %v1817_v33, %s2354_s29  ;;  %1830 = vrot.lane.b32.xlu1 %v1818_v29, %s2354_s29  ;;  %v1963_v33 = vrot.slane %v1953_v11, 7 }
 0x5bc   :  { %v1574_v26 = vpop.permute.xlu0 %1573  ;;  %v1572_v45 = vpop.permute.xlu1 %1571 }
 0x5bd   :  { %v3338_v1 = vsel %vm549_vm11, %v1572_v45, %v1574_v26 }
 0x5be   :  { %1832 = vrot.lane.b32.xlu0 %v1819_v49, %s2354_s29  ;;  %1834 = vrot.lane.b32.xlu1 %v1820_v23, %s2354_s29  ;;  %v1346_v49 = vmul.f32 %v3048_v17, %v1337_v14  ;;  %v1954_v23 = vmul.f32 %v1949_v4, %v3972_v59  ;;  %v3973_v14 = vld [vmem:[#allocation34_spill] sm:$0xff]  ;;  %v3976_v4 = vld [vmem:[#allocation51_spill] sm:$0xff] }
 0x5c0   :  { %v1578_v34 = vpop.permute.xlu0 %1577  ;;  %v1576_v24 = vpop.permute.xlu1 %1575 }
 0x5c1   :  { %v3349_v29 = vsel %vm549_vm11, %v1574_v26, %v1576_v24  ;;  %v3352_v54 = vsel %vm549_vm11, %v1576_v24, %v1578_v34  ;;  %v1333_v26 = vmul.f32 %v3119_v31, %v3953_v63  ;;  %v1951_v63 = vmul.f32 %v3075_v52, %v3973_v14 }
 0x5c2   :  { %1967 = vrot.lane.b32.xlu0 %v1962_v30, %s2357_s2  ;;  %1969 = vrot.lane.b32.xlu1 %v1963_v33, %s2357_s2  ;;  %v1964_v30 = vrot.slane %v1954_v23, 7  ;;  %v1704_v33 = vmul.f32 %v3128_v12, %v3958_v6 }
 0x5c3   :  { %v1338_v61 = vmul.f32 %v1333_v26, %v3955_v16  ;;  %v1956_v52 = vmul.f32 %v1951_v63, %v3975_v35 }
 0x5c4   :  { %v1295_v60 = vpop.permute.xlu0 %1294  ;;  %v1580_v38 = vpop.permute.xlu1 %1579  ;;  %v1709_v6 = vmul.f32 %v1704_v33, %v3961_v62  ;;  %v1711_v62 = vmul.f32 %v1706_v56, %v3964_v48  ;;  %v1907_v48 = vmul.f32 %v1902_v37, %v3970_v53 }
 0x5c5   :  { %v3365_v45 = vsel %vm549_vm11, %v1578_v34, %v1580_v38  ;;  %v1950_v34 = vmul.f32 %v3068_v19, %v3974_v2  ;;  %v1347_v16 = vmul.f32 %v3048_v17, %v1338_v61  ;;  %v1703_v19 = vmul.f32 %v3101_v43, %v3957_v36 }
 0x5c6   :  { %1358 = vrot.lane.b32.xlu0 %v1346_v49, %s2355_s0  ;;  %1354 = vrot.lane.b32.xlu1 %v1344_v20, %s2355_s0  ;;  %v1966_v23 = vrot.slane %v1956_v52, 7  ;;  %v1720_v12 = vmul.f32 %v3010_v8, %v1711_v62  ;;  %v1916_v53 = vmul.f32 %v3052_v55, %v1907_v48 }
 0x5c7   :  { %v1955_v38 = vmul.f32 %v1950_v34, %v3976_v4  ;;  %v1708_v36 = vmul.f32 %v1703_v19, %v3960_v57  ;;  %v1718_v34 = vmul.f32 %v3010_v8, %v1709_v6 }
 0x5c8   :  { %v1299_v25 = vpop.permute.xlu0 %1298  ;;  %v1293_v11 = vpop.permute.xlu1 %1292 }
 0x5c9   :  { %v3378_v24 = vsel %vm386_vm10, %v1293_v11, %v1295_v60  ;;  %v1965_v11 = vrot.slane %v1955_v38, 7  ;;  %v1717_v57 = vmul.f32 %v3010_v8, %v1708_v36 }
 0x5ca   :  { %1362 = vrot.lane.b32.xlu0 %v1348_v10, %s2355_s0  ;;  %1356 = vrot.lane.b32.xlu1 %v1345_v46, %s2355_s0 }
 0x5cc   :  { %v1493_v44 = vpop.permute.xlu0 %1492  ;;  %v1297_v28 = vpop.permute.xlu1 %1296 }
 0x5cd   :  { %v3390_v49 = vsel %vm386_vm10, %v1295_v60, %v1297_v28  ;;  %v3393_v20 = vsel %vm386_vm10, %v1297_v28, %v1299_v25  ;;  %v1705_v60 = vmul.f32 %v3110_v22, %v3959_v27 }
 0x5ce   :  { %1971 = vrot.lane.b32.xlu0 %v1964_v30, %s2357_s2  ;;  %1360 = vrot.lane.b32.xlu1 %v1347_v16, %s2355_s0  ;;  %v1901_v16 = vmul.f32 %v3101_v43, %v3967_v32  ;;  %v1903_v32 = vmul.f32 %v3110_v22, %v3971_v5  ;;  %v1905_v22 = vmul.f32 %v3137_v40, %v3973_v14 }
 0x5cf   :  { %v1710_v27 = vmul.f32 %v1705_v60, %v3963_v18 }
 0x5d0   :  { %v1497_v26 = vpop.permute.xlu0 %1496  ;;  %v1301_v10 = vpop.permute.xlu1 %1300  ;;  %v1906_v43 = vmul.f32 %v1901_v16, %v3969_v42  ;;  %v1908_v42 = vmul.f32 %v1903_v32, %v3972_v59  ;;  %v1910_v62 = vmul.f32 %v1905_v22, %v3975_v35  ;;  %v1310_v16 = vmul.f32 %v3378_v24, %v3004_v3 }
 0x5d1   :  { %v3404_v46 = vsel %vm386_vm10, %v1299_v25, %v1301_v10  ;;  %v1707_v25 = vmul.f32 %v3137_v40, %v3965_v0  ;;  %v1719_v28 = vmul.f32 %v3010_v8, %v1710_v27  ;;  %v1904_v0 = vmul.f32 %v3119_v31, %v3974_v2 }
 0x5d2   :  { %1975 = vrot.lane.b32.xlu0 %v1966_v23, %s2357_s2  ;;  %1973 = vrot.lane.b32.xlu1 %v1965_v11, %s2357_s2  ;;  %v1917_v60 = vmul.f32 %v3052_v55, %v1908_v42  ;;  %v1919_v37 = vmul.f32 %v3052_v55, %v1910_v62 }
 0x5d3   :  { %v1712_v18 = vmul.f32 %v1707_v25, %v3966_v9  ;;  %v1909_v31 = vmul.f32 %v1904_v0, %v3976_v4  ;;  %v1915_v4 = vmul.f32 %v3052_v55, %v1906_v43  ;;  %v1312_v43 = vmul.f32 %v3393_v20, %v3004_v3 }
 0x5d4   :  { %v1543_v61 = vpop.permute.xlu0 %1542  ;;  %v1491_v63 = vpop.permute.xlu1 %1490 }
 0x5d5   :  { %v3417_v30 = vsel %vm524_vm12, %v1491_v63, %v1493_v44  ;;  %v1721_v6 = vmul.f32 %v3010_v8, %v1712_v18  ;;  %v1918_v23 = vmul.f32 %v3052_v55, %v1909_v31  ;;  %v1318_v31 = vrot.slane %v1310_v16, 1 }
 0x5d6   :  { %1729 = vrot.lane.b32.xlu0 %v1718_v34, %s2356_s28  ;;  %1727 = vrot.lane.b32.xlu1 %v1717_v57, %s2356_s28  ;;  %v1320_v22 = vrot.slane %v1312_v43, 1  ;;  %v1508_v58 = vmul.f32 %v3417_v30, %v3006_v13 }
 0x5d8   :  { %v1547_v51 = vpop.permute.xlu0 %1546  ;;  %v1495_v33 = vpop.permute.xlu1 %1494 }
 0x5d9   :  { %v3430_v52 = vsel %vm524_vm12, %v1493_v44, %v1495_v33  ;;  %v3433_v38 = vsel %vm524_vm12, %v1495_v33, %v1497_v26 }
 0x5da   :  { %1733 = vrot.lane.b32.xlu0 %v1720_v12, %s2356_s28  ;;  %1731 = vrot.lane.b32.xlu1 %v1719_v28, %s2356_s28 }
 0x5dc   :  { %v1549_v19 = vpop.permute.xlu0 %1548  ;;  %v1499_v9 = vpop.permute.xlu1 %1498 }
 0x5dd   :  { %v3444_v2 = vsel %vm549_vm11, %v1547_v51, %v1549_v19  ;;  %v3447_v44 = vsel %vm524_vm12, %v1497_v26, %v1499_v9  ;;  %v1311_v9 = vmul.f32 %v3390_v49, %v3004_v3  ;;  %v1313_v49 = vmul.f32 %v3404_v46, %v3004_v3 }
 0x5de   :  { %1927 = vrot.lane.b32.xlu0 %v1916_v53, %s2357_s2  ;;  %1735 = vrot.lane.b32.xlu1 %v1721_v6, %s2356_s28 }
 0x5e0   :  { %v1666_v56 = vpop.permute.xlu0 %1665  ;;  %v1545_v10 = vpop.permute.xlu1 %1544 }
 0x5e1   :  { %v3457_v5 = vsel %vm549_vm11, %v1543_v61, %v1545_v10  ;;  %v3460_v26 = vsel %vm549_vm11, %v1545_v10, %v1547_v51 }
 0x5e2   :  { %1931 = vrot.lane.b32.xlu0 %v1918_v23, %s2357_s2  ;;  %1925 = vrot.lane.b32.xlu1 %v1915_v4, %s2357_s2  ;;  %v1319_v4 = vrot.slane %v1311_v9, 1 }
 0x5e4   :  { %v1670_v11 = vpop.permute.xlu0 %1669  ;;  %v1551_v36 = vpop.permute.xlu1 %1550 }
 0x5e5   :  { %v3467_v59 = vsel %vm549_vm11, %v1549_v19, %v1551_v36 }
 0x5e6   :  { %1929 = vrot.lane.b32.xlu1 %v1917_v60, %s2357_s2 }
 0x5e8   :  { %v1674_v40 = vpop.permute.xlu0 %1673  ;;  %v1668_v14 = vpop.permute.xlu1 %1667 }
 0x5e9   :  { %v3472_v61 = vsel %vm599_vm13, %v1666_v56, %v1668_v14  ;;  %v3475_v63 = vsel %vm599_vm13, %v1668_v14, %v1670_v11  ;;  %v1321_v14 = vrot.slane %v1313_v49, 1 }
 0x5ea   :  { %1933 = vrot.lane.b32.xlu1 %v1919_v37, %s2357_s2 }
 0x5ec   :  { %v1864_v34 = vpop.permute.xlu0 %1863  ;;  %v1672_v57 = vpop.permute.xlu1 %1671 }
 0x5ed   :  { %v3479_v35 = vsel %vm599_vm13, %v1670_v11, %v1672_v57  ;;  %v3482_v27 = vsel %vm599_vm13, %v1672_v57, %v1674_v40 }
 0x5ee   :  { %v3610_v55 = vmul.f32 %v3479_v35, %v3050_v47 }
 0x5f0   :  { %v1868_v25 = vpop.permute.xlu0 %1867  ;;  %v1866_v12 = vpop.permute.xlu1 %1865 }
 0x5f1   :  { %v3485_v48 = vsel %vm737_vm14, %v1864_v34, %v1866_v12  ;;  %v3488_v51 = vsel %vm737_vm14, %v1866_v12, %v1868_v25 }
 0x5f4   :  { %v1872_v33 = vpop.permute.xlu0 %1871  ;;  %v1870_v28 = vpop.permute.xlu1 %1869 }
 0x5f5   :  { %v3491_v18 = vsel %vm737_vm14, %v1868_v25, %v1870_v28  ;;  %v3494_v0 = vsel %vm737_vm14, %v1870_v28, %v1872_v33 }
 0x5f8   :  { %v1256_v53 = vpop.permute.xlu0 %1255  ;;  %v1258_v19 = vpop.permute.xlu1 %1257 }
 0x5f9   :  { %v1265_v6 = vsel %vm386_vm10, %v1256_v53, %v1258_v19 }
 0x5fa   :  { %v1273_v32 = vadd.f32 %v1265_v6, %v3199_v15 }
 0x5fc   :  { %v1260_v56 = vpop.permute.xlu0 %1259  ;;  %v1262_v10 = vpop.permute.xlu1 %1261  ;;  %v3504_v23 = vadd.f32 %v1318_v31, %v1273_v32 }
 0x5fd   :  { %v1266_v24 = vsel %vm386_vm10, %v1258_v19, %v1260_v56  ;;  %v1267_v42 = vsel %vm386_vm10, %v1260_v56, %v1262_v10 }
 0x5fe   :  { %v1274_v11 = vadd.f32 %v1266_v24, %v3205_v21  ;;  %v1275_v36 = vadd.f32 %v1267_v42, %v3217_v39 }
 0x600   :  { %v1264_v20 = vpop.permute.xlu0 %1263  ;;  %v1397_v60 = vpop.permute.xlu1 %1396  ;;  %v3512_v15 = vadd.f32 %v1319_v4, %v1274_v11  ;;  %v3514_v62 = vadd.f32 %v1320_v22, %v1275_v36  ;;  %v3566_v36 = vmul.f32 %v3338_v1, %v3008_v7  ;;  %v1509_v1 = vmul.f32 %v3430_v52, %v3006_v13 }
 0x601   :  { %v1268_v40 = vsel %vm386_vm10, %v1262_v10, %v1264_v20  ;;  %v3570_v20 = vmul.f32 %v3349_v29, %v3008_v7  ;;  %v3588_v29 = vmul.f32 %v3433_v38, %v3006_v13  ;;  %v3601_v52 = vmul.f32 %v3475_v63, %v3050_v47 }
 0x602   :  { %v1276_v37 = vadd.f32 %v1268_v40, %v3221_v41  ;;  %v3574_v40 = vmul.f32 %v3352_v54, %v3008_v7  ;;  %v3592_v54 = vmul.f32 %v3447_v44, %v3006_v13  ;;  %v3625_v38 = vmul.f32 %v3482_v27, %v3050_v47 }
 0x603   :  { %v1518_v63 = vrot.slane %v3588_v29, 1 }
 0x604   :  { %v1399_v34 = vpop.permute.xlu0 %1398  ;;  %v1401_v57 = vpop.permute.xlu1 %1400  ;;  %v3518_v25 = vadd.f32 %v1321_v14, %v1276_v37  ;;  %v3578_v14 = vmul.f32 %v3365_v45, %v3008_v7  ;;  %v3596_v7 = vmul.f32 %v3472_v61, %v3050_v47  ;;  %v1516_v61 = vrot.slane %v1508_v58, 1 }
 0x605   :  { %v1406_v37 = vsel %vm474_vm15, %v1397_v60, %v1399_v34 }
 0x608   :  { %v1403_v3 = vpop.permute.xlu0 %1402  ;;  %v1405_v46 = vpop.permute.xlu1 %1404 }
 0x609   :  { %v1408_v30 = vsel %vm474_vm15, %v1401_v57, %v1403_v3 }
 0x60c   :  { %v3520_v21 = vpop.permute.xlu0 %1453  ;;  %v3522_v39 = vpop.permute.xlu1 %1455 }
 0x610   :  { %v3524_v12 = vpop.permute.xlu0 %1457  ;;  %v3526_v33 = vpop.permute.xlu1 %1459 }
 0x614   :  { %v3528_v28 = vpop.permute.xlu0 %1461  ;;  %v3530_v16 = vpop.permute.xlu1 %1628 }
 0x618   :  { %v3532_v53 = vpop.permute.xlu0 %1630  ;;  %v3534_v41 = vpop.permute.xlu1 %1632 }
 0x61c   :  { %v3536_v19 = vpop.permute.xlu0 %1634  ;;  %v3538_v9 = vpop.permute.xlu1 %1636 }
 0x620   :  { %v3540_v6 = vpop.permute.xlu0 %1769  ;;  %v3542_v31 = vpop.permute.xlu1 %1771 }
 0x624   :  { %v3544_v43 = vpop.permute.xlu0 %1773  ;;  %v3546_v32 = vpop.permute.xlu1 %1775 }
 0x628   :  { %v3548_v56 = vpop.permute.xlu0 %1777  ;;  %v3550_v10 = vpop.permute.xlu1 %1826 }
 0x629   :  { %3977 = vst [vmem:[#allocation29_spill] sm:$0xff] %v3550_v10 }
 0x62c   :  { %v3552_v4 = vpop.permute.xlu0 %1828  ;;  %v3554_v24 = vpop.permute.xlu1 %1830 }
 0x62d   :  { %3978 = vst [vmem:[#allocation28_spill] sm:$0xff] %v3552_v4  ;;  %3979 = vst [vmem:[#allocation13_spill] sm:$0xff] %v3554_v24  ;;  %v1517_v24 = vrot.slane %v1509_v1, 1 }
 0x630   :  { %v3556_v42 = vpop.permute.xlu0 %1832  ;;  %v3558_v22 = vpop.permute.xlu1 %1834 }
 0x631   :  { %3980 = vst [vmem:[#allocation14_spill] sm:$0xff] %v3556_v42  ;;  %3981 = vst [vmem:[#allocation15_spill] sm:$0xff] %v3558_v22  ;;  %v1407_v22 = vsel %vm474_vm15, %v1399_v34, %v1401_v57  ;;  %v1414_v34 = vmul.f32 %v1406_v37, %v3048_v17  ;;  %v1519_v37 = vrot.slane %v3592_v54, 1  ;;  %v1409_v42 = vsel %vm474_vm15, %v1403_v3, %v1405_v46 }
 0x632   :  { %v1415_v44 = vmul.f32 %v1407_v22, %v3048_v17  ;;  %v1692_v22 = vrot.slane %v3601_v52, 1  ;;  %v1416_v57 = vmul.f32 %v1408_v30, %v3048_v17  ;;  %v3630_v46 = vmul.f32 %v3485_v48, %v3012_v50 }
 0x633   :  { %v1422_v58 = vrot.slane %v1414_v34, 1  ;;  %v3635_v34 = vmul.f32 %v3488_v51, %v3012_v50  ;;  %v1463_v48 = vsel %vm524_vm12, %v3520_v21, %v3522_v39 }
 0x634   :  { %v3560_v49 = vpop.permute.xlu0 %1967  ;;  %v3562_v11 = vpop.permute.xlu1 %1969  ;;  %v1423_v4 = vrot.slane %v1415_v44, 1 }
 0x638   :  { %v1359_v45 = vpop.permute.xlu0 %1358  ;;  %v1355_v60 = vpop.permute.xlu1 %1354 }
 0x63c   :  { %v1363_v10 = vpop.permute.xlu0 %1362  ;;  %v1357_v13 = vpop.permute.xlu1 %1356 }
 0x63d   :  { %v1364_v1 = vsel %vm474_vm15, %v1355_v60, %v1357_v13  ;;  %v1365_v35 = vsel %vm474_vm15, %v1357_v13, %v1359_v45  ;;  %v1417_v60 = vmul.f32 %v1409_v42, %v3048_v17  ;;  %v1464_v17 = vsel %vm524_vm12, %v3522_v39, %v3524_v12 }
 0x63e   :  { %v1372_v29 = vadd.f32 %v1364_v1, %v3504_v23  ;;  %v1373_v54 = vadd.f32 %v1365_v35, %v3512_v15  ;;  %v3639_v23 = vmul.f32 %v3491_v18, %v3012_v50  ;;  %v1424_v13 = vrot.slane %v1416_v57, 1 }
 0x63f   :  { %v1889_v1 = vrot.slane %v3630_v46, 1  ;;  %v1425_v35 = vrot.slane %v1417_v60, 1  ;;  %v3662_v57 = vmul.f32 %v3494_v0, %v3012_v50  ;;  %v1638_v50 = vsel %vm599_vm13, %v3530_v16, %v3532_v53 }
 0x640   :  { %v1430_v15 = vadd.f32 %v1422_v58, %v1372_v29  ;;  %v1431_v30 = vadd.f32 %v1423_v4, %v1373_v54  ;;  %v3641_v47 = vpop.permute.xlu0 %1971  ;;  %v1361_v27 = vpop.permute.xlu1 %1360  ;;  %v1694_v58 = vrot.slane %v3625_v38, 1  ;;  %v1890_v29 = vrot.slane %v3635_v34, 1 }
 0x641   :  { %v1366_v51 = vsel %vm474_vm15, %v1359_v45, %v1361_v27  ;;  %v1367_v42 = vsel %vm474_vm15, %v1361_v27, %v1363_v10  ;;  %v1780_v0 = vsel %vm687_vm0, %v3542_v31, %v3544_v43  ;;  %v1639_v16 = vsel %vm599_vm13, %v3532_v53, %v3534_v41 }
 0x642   :  { %v1471_v18 = vadd.f32 %v1463_v48, %v1430_v15  ;;  %v1472_v44 = vadd.f32 %v1464_v17, %v1431_v30  ;;  %v1374_v4 = vadd.f32 %v1366_v51, %v3514_v62  ;;  %v1375_v21 = vadd.f32 %v1367_v42, %v3518_v25 }
 0x643   :  { %v1465_v62 = vsel %vm524_vm12, %v3524_v12, %v3526_v33  ;;  %v1779_v25 = vsel %vm687_vm0, %v3540_v6, %v3542_v31  ;;  %v3983_v51 = vrot.slane %v3570_v20, 1  ;;  %v1782_v53 = vsel %vm687_vm0, %v3546_v32, %v3548_v56 }
 0x644   :  { %v1524_v54 = vadd.f32 %v1516_v61, %v1471_v18  ;;  %v1525_v39 = vadd.f32 %v1517_v24, %v1472_v44  ;;  %v1432_v3 = vadd.f32 %v1424_v13, %v1374_v4  ;;  %v3656_v45 = vpop.permute.xlu0 %1975  ;;  %v3658_v10 = vpop.permute.xlu1 %1973  ;;  %v1433_v60 = vadd.f32 %v1425_v35, %v1375_v21 }
 0x645   :  { %v1891_v24 = vrot.slane %v3639_v23, 1  ;;  %v1466_v61 = vsel %vm524_vm12, %v3526_v33, %v3528_v28  ;;  %v1787_v27 = vmul.f32 %v1779_v25, %v3010_v8  ;;  %v1781_v33 = vsel %vm687_vm0, %v3544_v43, %v3546_v32 }
 0x646   :  { %v1473_v15 = vadd.f32 %v1465_v62, %v1432_v3  ;;  %v1560_v30 = vadd.f32 %v3457_v5, %v1524_v54  ;;  %v1474_v12 = vadd.f32 %v1466_v61, %v1433_v60  ;;  %v1561_v6 = vadd.f32 %v3460_v26, %v1525_v39  ;;  %v3987_v61 = vld [vmem:[#allocation28_spill] sm:$0xff] }
 0x647   :  { %v3982_v5 = vrot.slane %v3566_v36, 1  ;;  %v1640_v26 = vsel %vm599_vm13, %v3534_v41, %v3536_v19  ;;  %v1641_v43 = vsel %vm599_vm13, %v3536_v19, %v3538_v9  ;;  %v1788_v36 = vmul.f32 %v1780_v0, %v3010_v8  ;;  %v3989_v0 = vld [vmem:[#allocation58_spill] sm:$0xff] }
 0x648   :  { %v1526_v28 = vadd.f32 %v1518_v63, %v1473_v15  ;;  %v1730_v3 = vpop.permute.xlu0 %1729  ;;  %v1728_v17 = vpop.permute.xlu1 %1727  ;;  %v1527_v31 = vadd.f32 %v1519_v37, %v1474_v12  ;;  %v1606_v42 = vadd.f32 %v3983_v51, %v1561_v6  ;;  %v1789_v18 = vmul.f32 %v1781_v33, %v3010_v8 }
 0x649   :  { %v1605_v48 = vadd.f32 %v3982_v5, %v1560_v30  ;;  %v1795_v20 = vrot.slane %v1787_v27, 1  ;;  %v1977_v44 = vsel %vm808_vm1, %v3560_v49, %v3562_v11  ;;  %v3984_v19 = vrot.slane %v3596_v7, 1 }
 0x64a   :  { %v1562_v13 = vadd.f32 %v3444_v2, %v1526_v28  ;;  %v1647_v41 = vadd.f32 %v1639_v16, %v1606_v42  ;;  %v1563_v37 = vadd.f32 %v3467_v59, %v1527_v31  ;;  %v3985_v2 = vrot.slane %v3574_v40, 1  ;;  %v3988_v40 = vld [vmem:[#allocation29_spill] sm:$0xff]  ;;  %v3992_v31 = vld [vmem:[#allocation14_spill] sm:$0xff]  ;;  %v3993_v42 = vld [vmem:[#allocation15_spill] sm:$0xff] }
 0x64b   :  { %v1646_v63 = vadd.f32 %v1638_v50, %v1605_v48  ;;  %v1737_v54 = vsel %vm687_vm0, %v1728_v17, %v1730_v3  ;;  %v3986_v56 = vrot.slane %v3578_v14, 1  ;;  %v1796_v62 = vrot.slane %v1788_v36, 1  ;;  %v3991_v48 = vld [vmem:[#allocation13_spill] sm:$0xff] }
 0x64c   :  { %v1734_v4 = vpop.permute.xlu0 %1733  ;;  %v1607_v35 = vadd.f32 %v3985_v2, %v1562_v13  ;;  %v1732_v21 = vpop.permute.xlu1 %1731  ;;  %v1700_v32 = vadd.f32 %v1692_v22, %v1647_v41  ;;  %v1790_v49 = vmul.f32 %v1782_v53, %v3010_v8  ;;  %v1797_v60 = vrot.slane %v1789_v18, 1 }
 0x64d   :  { %v1699_v9 = vadd.f32 %v3984_v19, %v1646_v63  ;;  %v1738_v59 = vsel %vm687_vm0, %v1730_v3, %v1732_v21  ;;  %v1608_v39 = vadd.f32 %v3986_v56, %v1563_v37  ;;  %v1836_v15 = vsel %vm737_vm14, %v3988_v40, %v3987_v61 }
 0x64e   :  { %v1648_v25 = vadd.f32 %v1640_v26, %v1607_v35  ;;  %v1746_v30 = vadd.f32 %v1738_v59, %v1700_v32  ;;  %v1985_v52 = vmul.f32 %v1977_v44, %v3989_v0  ;;  %v1978_v22 = vsel %vm808_vm1, %v3562_v11, %v3641_v47 }
 0x64f   :  { %v1745_v7 = vadd.f32 %v1737_v54, %v1699_v9  ;;  %v1649_v50 = vadd.f32 %v1641_v43, %v1608_v39  ;;  %v3990_v12 = vrot.slane %v3610_v55, 1  ;;  %v1739_v27 = vsel %vm687_vm0, %v1732_v21, %v1734_v4 }
 0x650   :  { %v1736_v8 = vpop.permute.xlu1 %1735  ;;  %v1804_v33 = vadd.f32 %v1796_v62, %v1746_v30  ;;  %v1798_v5 = vrot.slane %v1790_v49, 1  ;;  %v1837_v17 = vsel %vm737_vm14, %v3987_v61, %v3991_v48  ;;  %v1928_v11 = vpop.permute.xlu0 %1927  ;;  %v1838_v55 = vsel %vm737_vm14, %v3991_v48, %v3992_v31 }
 0x651   :  { %v1803_v14 = vadd.f32 %v1795_v20, %v1745_v7  ;;  %v1701_v6 = vadd.f32 %v3990_v12, %v1648_v25  ;;  %v1702_v28 = vadd.f32 %v1694_v58, %v1649_v50  ;;  %v1740_v3 = vsel %vm687_vm0, %v1734_v4, %v1736_v8 }
 0x652   :  { %v1979_v51 = vsel %vm808_vm1, %v3641_v47, %v3658_v10  ;;  %v1845_v58 = vadd.f32 %v1837_v17, %v1804_v33  ;;  %v1839_v43 = vsel %vm737_vm14, %v3992_v31, %v3993_v42  ;;  %v1986_v36 = vmul.f32 %v1978_v22, %v3989_v0  ;;  %v3996_v17 = vld [vmem:[#allocation12_spill] sm:$0xff]  ;;  %v3998_v31 = vld [vmem:[#allocation54_spill] sm:$0xff] }
 0x653   :  { %v1747_v16 = vadd.f32 %v1739_v27, %v1701_v6  ;;  %v1844_v26 = vadd.f32 %v1836_v15, %v1803_v14  ;;  %v1748_v38 = vadd.f32 %v1740_v3, %v1702_v28  ;;  %v1993_v53 = vrot.slane %v1985_v52, 1  ;;  %v3994_v3 = vld [vmem:[#allocation16_spill] sm:$0xff] }
 0x654   :  { %v1926_v18 = vpop.permute.xlu1 %1925  ;;  %v1898_v47 = vadd.f32 %v1890_v29, %v1845_v58  ;;  %v1980_v20 = vsel %vm808_vm1, %v3658_v10, %v3656_v45  ;;  %v1987_v44 = vmul.f32 %v1979_v51, %v3989_v0  ;;  %v1892_v4 = vrot.slane %v3662_v57, 1  ;;  %v1932_v2 = vpop.permute.xlu0 %1931  ;;  %v3999_v58 = vld [vmem:[#allocation18_spill] sm:$0xff] }
 0x655   :  { %v1805_v63 = vadd.f32 %v1797_v60, %v1747_v16  ;;  %v1897_v13 = vadd.f32 %v1889_v1, %v1844_v26  ;;  %v1806_v41 = vadd.f32 %v1798_v5, %v1748_v38  ;;  %v1935_v37 = vsel %vm808_vm1, %v1926_v18, %v1928_v11  ;;  %v3995_v5 = vld [vmem:[#allocation52_spill] sm:$0xff] }
 0x656   :  { %v1994_v1 = vrot.slane %v1986_v36, 1  ;;  %v1988_v34 = vmul.f32 %v1980_v20, %v3989_v0  ;;  %v1995_v32 = vrot.slane %v1987_v44, 1  ;;  %v260_v48 = vmul.f32 %v3995_v5, %v3994_v3 }
 0x657   :  { %v1943_v19 = vadd.f32 %v1935_v37, %v1897_v13  ;;  %v1846_v9 = vadd.f32 %v1838_v55, %v1805_v63  ;;  %v1847_v46 = vadd.f32 %v1839_v43, %v1806_v41  ;;  %v261_v42 = vmul.f32 %v3995_v5, %v3999_v58  ;;  %v4000_v63 = vld [vmem:[#allocation17_spill] sm:$0xff]  ;;  %v4001_v41 = vld [vmem:[#allocation55_spill] sm:$0xff] }
 0x658   :  { %v1930_v54 = vpop.permute.xlu1 %1929  ;;  %v1996_v25 = vrot.slane %v1988_v34, 1  ;;  %v262_v13 = vmul.f32 %v3995_v5, %v4000_v63 }
 0x659   :  { %v2001_v35 = vadd.f32 %v1993_v53, %v1943_v19  ;;  %v1899_v21 = vadd.f32 %v1891_v24, %v1846_v9  ;;  %v1936_v29 = vsel %vm808_vm1, %v1928_v11, %v1930_v54  ;;  %v1937_v45 = vsel %vm808_vm1, %v1930_v54, %v1932_v2  ;;  %v3997_v11 = vld [vmem:[#allocation53_spill] sm:$0xff]  ;;  %v4002_v19 = vld [vmem:[#allocation56_spill] sm:$0xff] }
 0x65a   :  { %v1900_v10 = vadd.f32 %v1892_v4, %v1847_v46  ;;  %v1944_v56 = vadd.f32 %v1936_v29, %v1898_v47  ;;  %v268_v26 = vadd.f32 %v3997_v11, %v260_v48  ;;  %v269_v53 = vadd.f32 %v3997_v11, %v261_v42  ;;  %v4003_v4 = vld [vmem:[#allocation19_spill] sm:$0xff]  ;;  %v4004_v54 = vld [vmem:[#allocation57_spill] sm:$0xff] }
 0x65b   :  { %v2005_v59 = vsub.f32 0.0, %v2001_v35  ;;  %v1945_v39 = vadd.f32 %v1937_v45, %v1899_v21  ;;  %v270_v44 = vadd.f32 %v3997_v11, %v262_v13  ;;  %v263_v46 = vmul.f32 %v3995_v5, %v4003_v4 }
 0x65c   :  { %v2002_v62 = vadd.f32 %v1994_v1, %v1944_v56  ;;  %v1934_v7 = vpop.permute.xlu1 %1933 }
 0x65d   :  { %v2009_v57 = vmul.f32 1.442695, %v2005_v59  ;;  %v2003_v49 = vadd.f32 %v1995_v32, %v1945_v39  ;;  %v1938_v23 = vsel %vm808_vm1, %v1932_v2, %v1934_v7  ;;  %v271_v21 = vadd.f32 %v3997_v11, %v263_v46 }
 0x65e   :  { %v2006_v24 = vsub.f32 0.0, %v2002_v62  ;;  %v1946_v61 = vadd.f32 %v1938_v23, %v1900_v10 }
 0x65f   :  { %2248 = vpow2.f32 %v2009_v57  ;;  %v2007_v60 = vsub.f32 0.0, %v2003_v49 }
 0x660   :  { %v2011_v40 = vmul.f32 1.442695, %v2006_v24  ;;  %v2004_v30 = vadd.f32 %v1996_v25, %v1946_v61 }
 0x661   :  { %v2013_v15 = vmul.f32 1.442695, %v2007_v60 }
 0x662   :  { %2250 = vpow2.f32 %v2011_v40  ;;  %v2008_v50 = vsub.f32 0.0, %v2004_v30 }
 0x663   :  { %2252 = vpow2.f32 %v2013_v15 }
 0x664   :  { %v2015_v0 = vmul.f32 1.442695, %v2008_v50 }
 0x666   :  { %2254 = vpow2.f32 %v2015_v0 }
 0x669   :  { %v2249_v52 = vpop.eup %2248 }
 0x66a   :  { %v2017_v22 = vadd.f32 1.0, %v2249_v52 }
 0x66c   :  { %2256 = vrcp.f32 %v2017_v22  ;;  %v2251_v14 = vpop.eup %2250 }
 0x66d   :  { %v2253_v12 = vpop.eup %2252  ;;  %v2018_v6 = vadd.f32 1.0, %v2251_v14 }
 0x66e   :  { %v2019_v8 = vadd.f32 1.0, %v2253_v12 }
 0x66f   :  { %2258 = vrcp.f32 %v2018_v6 }
 0x670   :  { %v2255_v27 = vpop.eup %2254  ;;  %2260 = vrcp.f32 %v2019_v8 }
 0x671   :  { %v2020_v33 = vadd.f32 1.0, %v2255_v27 }
 0x673   :  { %2262 = vrcp.f32 %v2020_v33 }
 0x676   :  { %v2257_v28 = vpop.eup %2256 }
 0x677   :  { %v2028_v16 = vrot.slane %v2257_v28, %v3996_v17 }
 0x679   :  { %v2041_v55 = vmul.f32 %v2028_v16, %v3998_v31  ;;  %v2259_v51 = vpop.eup %2258 }
 0x67a   :  { %v2261_v38 = vpop.eup %2260  ;;  %v2032_v43 = vrot.slane %v2259_v51, %v3996_v17 }
 0x67b   :  { %v2045_v36 = vadd.f32 %v2041_v55, %v268_v26  ;;  %v2036_v18 = vrot.slane %v2261_v38, %v3996_v17 }
 0x67c   :  { %v2042_v37 = vmul.f32 %v2032_v43, %v4001_v41 }
 0x67d   :  { %v2049_v47 = vmax.f32 %v2045_v36, 0.0  ;;  %v2263_v20 = vpop.eup %2262  ;;  %v2043_v9 = vmul.f32 %v2036_v18, %v4002_v19 }
 0x67e   :  { %v2040_v1 = vrot.slane %v2263_v20, %v3996_v17  ;;  %v2046_v2 = vadd.f32 %v2042_v37, %v269_v53 }
 0x67f   :  { %2053 = vst [vmem:[#allocation8] sm:$0xff] %v2049_v47  ;;  %v2047_v35 = vadd.f32 %v2043_v9, %v270_v44 }
 0x680   :  { %v2044_v34 = vmul.f32 %v2040_v1, %v4004_v54  ;;  %v2050_v29 = vmax.f32 %v2046_v2, 0.0 }
 0x681   :  { %v2051_v45 = vmax.f32 %v2047_v35, 0.0 }
 0x682   :  { %v2048_v10 = vadd.f32 %v2044_v34, %v271_v21  ;;  %2054 = vst [vmem:[#allocation8 + $0x8] sm:$0xff] %v2050_v29 }
 0x683   :  { %2055 = vst [vmem:[#allocation8 + $0x10] sm:$0xff] %v2051_v45 }
 0x684   :  { %v2052_v32 = vmax.f32 %v2048_v10, 0.0 }
 0x686   :  { %2056 = vst [vmem:[#allocation8 + $0x18] sm:$0xff] %v2052_v32 }
 0x687   :  { %2320 = shalt.err (!%p2317_p6)
}
 0x688   :  { %s2321_s17 = scalar_lea.hbm %s3802_s8, 512 }
 0x689   :  { %p2322_p7 = scmp.ne.s32.totalorder %s3802_s8, %s2321_s17  ;;  %p2325_p8 = scmp.lt.u32.totalorder %s2321_s17, %s3802_s8 }
 0x68b   :  { %p2327_p9 = pnand %p2325_p8, %p2322_p7 }
 0x68d   :  { %2330 = shalt.err (!%p2327_p9)
}
 0x68e   :  { %2066 = dma.vmem_to_hbm [thread:$0]  %s2064_s7, 512, %s3802_s8, [#allocation5]  }
 0x68f   :  { %2335 = dma.done.wait [#allocation5], 512  }
 0x690   :  { %2336 = vsyncadd [#allocation5], 4294966784 }
 0x691   :  { %2070 = vsyncpa [#allocation4], 1 }
 0x692   :  { %2071 = vsyncpa [#allocation7], 1 }
 0x693   :  { %2072 = vsyncpa [#allocation5], 1 }

</bundles_post_ra>
